<compile_context>
chip_gen: v6e
topology: v6e:2x2x1
jax: 0.10.0
libtpu: 0.0.40
codegen_flags: <defaults>
</compile_context>

<pallas_src>
import functools

import jax
import jax.numpy as jnp
from jax.experimental import pallas as pl
from jax.experimental.pallas import tpu as pltpu

K = 5                 # TAGConv K
NEG_SLOPE = 0.01      # F.leaky_relu default
LANE = 128
ROW_BLK = 512         # A row-block size for the DMA/compute-overlapped prologue


def _round_up(v, m):
    return ((v + m - 1) // m) * m


def _leaky(v):
    return jnp.where(v >= 0.0, v, NEG_SLOPE * v)


def _vmem_limit_bytes():
    """Per-generation scoped-VMEM limit (~78% of physical: ~100 MiB v5e/v6e, ~50 MiB v7x)."""
    try:
        cap = pltpu.get_tpu_info().vmem_capacity_bytes
    except Exception:
        cap = 64 * 1024 * 1024          # conservative fallback (fits every generation)
    return int(cap * 0.78)


# ---------------- Pallas kernel: fused gnn_basic forward (all layers, all hops) ----------------
def gnn_kernel(a_hbm, x_ref, w_ref, b_ref, o_ref, a_vmem, xk_vmem, sem,
               *, num_layers, nblk, row_blk):
    # a_hbm  : (Np, Np)              bf16 normalized adjacency, left in HBM (pl.ANY), manual DMA
    # x_ref  : (Np, Fpad)            bf16 node features (zero padded)
    # w_ref  : (L, K+1, Fpad, Fpad)  bf16 per-layer / per-hop weights
    # b_ref  : (L, 1, Fpad)          f32 per-layer bias
    # o_ref  : (Np, Fpad)            f32 output (lane-dense, unmasked stores)
    # a_vmem : (Np, Np)              bf16 VMEM copy of A, resident across hops & layers
    # xk_vmem: (Np, Fpad)            bf16 staging for the block-wise hop-1 result
    # sem    : DMA((2,))             semaphores for the double-buffered A row-block DMA
    x = x_ref[...]                                         # bf16, carried across layers

    # ---- overlap the A HBM->VMEM prologue with layer-0 hop-0 / hop-1 compute ----
    copies = [
        pltpu.make_async_copy(a_hbm.at[pl.ds(i * row_blk, row_blk), :],
                              a_vmem.at[pl.ds(i * row_blk, row_blk), :],
                              sem.at[i % 2])
        for i in range(nblk)
    ]
    copies[0].start()

    # layer-0 hop-0 projection runs while the first A row block is still in flight
    acc = jnp.dot(x, w_ref[0, 0], preferred_element_type=jnp.float32)      # MXU, f32 acc

    # layer-0 hop-1: consume A row blocks as they land, prefetching the next one
    for i in range(nblk):
        copies[i].wait()
        if i + 1 < nblk:
            copies[i + 1].start()
        rows = jnp.dot(a_vmem[pl.ds(i * row_blk, row_blk), :], x,
                       preferred_element_type=jnp.float32)
        xk_vmem[pl.ds(i * row_blk, row_blk), :] = rows.astype(jnp.bfloat16)

    a = a_vmem[...]                                        # A fully resident from here on
    xk = xk_vmem[...]
    acc = acc + jnp.dot(xk, w_ref[0, 1], preferred_element_type=jnp.float32)

    # layer-0 remaining hops (projection accumulated on the fly -> no H concat scratch)
    for k in range(2, K + 1):
        xk = jnp.dot(a, xk, preferred_element_type=jnp.float32).astype(jnp.bfloat16)
        acc = acc + jnp.dot(xk, w_ref[0, k], preferred_element_type=jnp.float32)
    act = _leaky(acc + b_ref[0])                           # f32 bias + leaky_relu (VPU)
    x = act.astype(jnp.bfloat16)

    # remaining layers: A is already resident in VMEM
    for layer in range(1, num_layers):
        acc = jnp.dot(x, w_ref[layer, 0], preferred_element_type=jnp.float32)
        xk = x
        for k in range(1, K + 1):
            xk = jnp.dot(a, xk, preferred_element_type=jnp.float32).astype(jnp.bfloat16)
            acc = acc + jnp.dot(xk, w_ref[layer, k], preferred_element_type=jnp.float32)
        act = _leaky(acc + b_ref[layer])
        x = act.astype(jnp.bfloat16)

    o_ref[...] = act                                       # f32 output of the last layer


# ---------------- Plain-JAX glue: graph normalization + padding + param packing ----------------
def gcn_norm_dense(edge_index, edge_weight, num_nodes):
    """PyG gcn_norm (add_self_loops=False), returned as a dense (N, N) matrix."""
    row, col = edge_index[0], edge_index[1]            # row = source j, col = target i
    deg = jnp.zeros((num_nodes,), jnp.float32).at[col].add(edge_weight)
    deg_inv_sqrt = jnp.where(deg > 0, deg ** -0.5, 0.0)
    norm_w = deg_inv_sqrt[row] * edge_weight * deg_inv_sqrt[col]
    a = jnp.zeros((num_nodes, num_nodes), jnp.float32).at[col, row].add(norm_w)
    return a


def init_params(key, num_features_list):
    """Deterministic synthetic init per TAGConv layer: (K+1, Fin, Fout) weights + (1, Fout) bias."""
    params = []
    for i in range(len(num_features_list) - 1):
        f_in, f_out = num_features_list[i], num_features_list[i + 1]
        key, kw = jax.random.split(key)
        w = 0.1 * jax.random.normal(kw, (K + 1, f_in, f_out), jnp.float32)
        b = jnp.zeros((1, f_out), jnp.float32)
        params.append((w, b))
    return params


def prepare_graph_and_params(params, edge_index, edge_weight, num_nodes, f_in):
    """Hoisted out of the per-forward path: dense normalized A (bf16, padded) + packed W/b."""
    feat_dims = [f_in] + [w.shape[-1] for (w, _) in params]
    fpad = _round_up(max(feat_dims), LANE)              # lane-dense feature width (>=128)
    npad = _round_up(num_nodes, LANE)                   # lane/sublane-aligned node count
    if npad > ROW_BLK:
        row_blk = ROW_BLK
        npad = _round_up(npad, row_blk)
    else:
        row_blk = npad
    nblk = npad // row_blk

    # dense normalized adjacency, zero-padded, bf16 for the MXU (stays in HBM at call time)
    a = gcn_norm_dense(edge_index, edge_weight, num_nodes)
    a_pad = (jnp.zeros((npad, npad), jnp.float32)
             .at[:num_nodes, :num_nodes].set(a).astype(jnp.bfloat16))

    # stack + zero-pad per-layer weights / bias into uniform Fpad->Fpad blocks
    w_all, b_all = [], []
    for (w, b) in params:
        fi, fo = w.shape[1], w.shape[2]
        w_pad = jnp.zeros((K + 1, fpad, fpad), jnp.float32).at[:, :fi, :fo].set(w)
        w_all.append(w_pad.astype(jnp.bfloat16))
        b_all.append(jnp.zeros((1, fpad), jnp.float32).at[:, :fo].set(b))
    w_all = jnp.stack(w_all, axis=0)                    # (L, K+1, Fpad, Fpad) bf16
    b_all = jnp.stack(b_all, axis=0)                    # (L, 1, Fpad) f32

    meta = dict(npad=npad, fpad=fpad, row_blk=row_blk, nblk=nblk,
                num_layers=len(params), n=num_nodes, f_in=f_in, f_out=feat_dims[-1])
    return a_pad, w_all, b_all, meta


def gnn_basic_forward(a_pad, w_all, b_all, x, meta):
    n, f_in = x.shape
    npad, fpad = meta["npad"], meta["fpad"]

    # per-call work is just padding x (bf16: x is only ever an MXU input)
    x_pad = jnp.zeros((npad, fpad), jnp.bfloat16).at[:n, :f_in].set(x.astype(jnp.bfloat16))

    # generation-aware VMEM budget check for the fully-resident design
    vmem_limit = _vmem_limit_bytes()
    need = (npad * npad * 2                    # resident A (bf16 scratch)
            + 2 * npad * fpad * 2              # x + xk staging (bf16)
            + npad * fpad * 4                  # output (f32)
            + w_all.size * 2 + b_all.size * 4)  # packed weights / bias
    if need > int(0.9 * vmem_limit):
        # TODO(synk): large-N path — scalar-prefetch sparse gather (or tiled dense grid).
        raise NotImplementedError("graph too large for the resident-VMEM fused kernel")

    kernel = functools.partial(gnn_kernel, num_layers=meta["num_layers"],
                               nblk=meta["nblk"], row_blk=meta["row_blk"])
    vmem = pl.BlockSpec(memory_space=pltpu.MemorySpace.VMEM)   # single-buffered, no pipelining
    out = pl.pallas_call(
        kernel,
        out_shape=jax.ShapeDtypeStruct((npad, fpad), jnp.float32),
        in_specs=[pl.BlockSpec(memory_space=pl.ANY),   # A stays in HBM; manual row-block DMA
                  vmem, vmem, vmem],
        out_specs=vmem,
        scratch_shapes=[pltpu.VMEM((npad, npad), jnp.bfloat16),   # resident A
                        pltpu.VMEM((npad, fpad), jnp.bfloat16),   # hop-1 staging
                        pltpu.SemaphoreType.DMA((2,))],
        compiler_params=pltpu.CompilerParams(vmem_limit_bytes=vmem_limit),
    )(a_pad, x_pad, w_all, b_all)
    return out[:n, :meta["f_out"]]


# ---------------- Pure-JAX reference (mirrors the kernel's bf16-carry math exactly) ------------
def gnn_basic_ref(params, x, edge_index, edge_weight):
    a = gcn_norm_dense(edge_index, edge_weight, x.shape[0]).astype(jnp.bfloat16)
    xb = x.astype(jnp.bfloat16)
    act = x
    for (w, b) in params:
        wb = w.astype(jnp.bfloat16)
        acc = jnp.dot(xb, wb[0], preferred_element_type=jnp.float32)
        xk = xb
        for k in range(1, K + 1):
            xk = jnp.dot(a, xk, preferred_element_type=jnp.float32).astype(jnp.bfloat16)
            acc = acc + jnp.dot(xk, wb[k], preferred_element_type=jnp.float32)
        act = _leaky(acc + b)
        xb = act.astype(jnp.bfloat16)
    return act


if __name__ == "__main__":
    key = jax.random.PRNGKey(0)
    num_nodes = 16
    num_edges = 40
    num_features_list = [8, 16, 8]     # two TAGConv layers: 8->16, 16->8

    k_x, k_src, k_dst, k_w, k_p = jax.random.split(key, 5)
    x = jax.random.normal(k_x, (num_nodes, num_features_list[0]), jnp.float32)
    src = jax.random.randint(k_src, (num_edges,), 0, num_nodes)
    dst = jax.random.randint(k_dst, (num_edges,), 0, num_nodes)
    edge_index = jnp.stack([src, dst], axis=0)                       # (2, E)
    edge_weight = jax.random.uniform(k_w, (num_edges,), jnp.float32, 0.1, 1.0)

    params = init_params(k_p, num_features_list)

    # graph normalization + weight packing hoisted out of the per-forward path (static graph)
    a_pad, w_all, b_all, meta = prepare_graph_and_params(
        params, edge_index, edge_weight, num_nodes, num_features_list[0])

    out = gnn_basic_forward(a_pad, w_all, b_all, x, meta)
    out = jax.block_until_ready(out)

    ref = gnn_basic_ref(params, x, edge_index, edge_weight)
    assert out.shape == (num_nodes, num_features_list[-1])
    assert jnp.allclose(out, ref, atol=2e-3, rtol=2e-3), "mismatch vs JAX reference"

    print("KERNEL_OK")
</pallas_src>

<mosaic_0001>
module attributes {stable_mosaic.version = 11 : i64} {
  func.func @gnn_kernel(%arg0: memref<128x128xbf16, #tpu.memory_space<any>>, %arg1: memref<128x128xbf16, #tpu.memory_space<vmem>>, %arg2: memref<2x6x128x128xbf16, #tpu.memory_space<vmem>>, %arg3: memref<2x1x128xf32, #tpu.memory_space<vmem>>, %arg4: memref<128x128xf32, #tpu.memory_space<vmem>>, %arg5: memref<128x128xbf16, #tpu.memory_space<vmem>>, %arg6: memref<128x128xbf16, #tpu.memory_space<vmem>>, %arg7: memref<2x!tpu.dma_semaphore, #tpu.memory_space<semaphore_mem>>) attributes {dimension_semantics = [], scalar_prefetch = 0 : i64, scratch_operands = 3 : i64, tpu.core_type = #tpu.core_type<tc>} {
    %c0 = arith.constant 0 : index
    %c0_0 = arith.constant 0 : index
    %0 = vector.load %arg1[%c0, %c0_0] : memref<128x128xbf16, #tpu.memory_space<vmem>>, vector<128x128xbf16>
    %c0_i32 = arith.constant 0 : i32
    %c0_i32_1 = arith.constant 0 : i32
    %c0_i32_2 = arith.constant 0 : i32
    %1 = tpu.memref_slice %arg0[%c0_i32_1, %c0_i32_2] : memref<128x128xbf16, #tpu.memory_space<any>> -> memref<128x128xbf16, #tpu.memory_space<any>>
    %c0_i32_3 = arith.constant 0 : i32
    %c0_i32_4 = arith.constant 0 : i32
    %2 = tpu.memref_slice %arg5[%c0_i32_3, %c0_i32_4] : memref<128x128xbf16, #tpu.memory_space<vmem>> -> memref<128x128xbf16, #tpu.memory_space<vmem>>
    %3 = tpu.memref_slice %arg7[%c0_i32] : memref<2x!tpu.dma_semaphore, #tpu.memory_space<semaphore_mem>> -> memref<1x!tpu.dma_semaphore, #tpu.memory_space<semaphore_mem>>
    %4 = tpu.memref_squeeze %3 : memref<1x!tpu.dma_semaphore, #tpu.memory_space<semaphore_mem>> -> memref<!tpu.dma_semaphore, #tpu.memory_space<semaphore_mem>>
    tpu.enqueue_dma source(%1 : memref<128x128xbf16, #tpu.memory_space<any>>) target(%2 : memref<128x128xbf16, #tpu.memory_space<vmem>>) target_semaphore(%4 : memref<!tpu.dma_semaphore, #tpu.memory_space<semaphore_mem>>)
    %c0_5 = arith.constant 0 : index
    %c0_6 = arith.constant 0 : index
    %c0_7 = arith.constant 0 : index
    %c0_8 = arith.constant 0 : index
    %5 = vector.load %arg2[%c0_5, %c0_6, %c0_7, %c0_8] : memref<2x6x128x128xbf16, #tpu.memory_space<vmem>>, vector<1x1x128x128xbf16>
    %6 = vector.shape_cast %5 : vector<1x1x128x128xbf16> to vector<128x128xbf16>
    %cst = arith.constant dense<0.000000e+00> : vector<128x128xf32>
    %7 = tpu.matmul %0, %6, %cst {dimension_numbers = #tpu.dot_dimension_numbers<[1], [0], [0], [1], [0, 0, 1, 1], [], []>} : vector<128x128xbf16>, vector<128x128xbf16>, vector<128x128xf32> -> vector<128x128xf32>
    %c0_i32_9 = arith.constant 0 : i32
    %c0_i32_10 = arith.constant 0 : i32
    %c0_i32_11 = arith.constant 0 : i32
    %8 = tpu.memref_slice %arg0[%c0_i32_10, %c0_i32_11] : memref<128x128xbf16, #tpu.memory_space<any>> -> memref<128x128xbf16, #tpu.memory_space<any>>
    %c0_i32_12 = arith.constant 0 : i32
    %c0_i32_13 = arith.constant 0 : i32
    %9 = tpu.memref_slice %arg5[%c0_i32_12, %c0_i32_13] : memref<128x128xbf16, #tpu.memory_space<vmem>> -> memref<128x128xbf16, #tpu.memory_space<vmem>>
    %10 = tpu.memref_slice %arg7[%c0_i32_9] : memref<2x!tpu.dma_semaphore, #tpu.memory_space<semaphore_mem>> -> memref<1x!tpu.dma_semaphore, #tpu.memory_space<semaphore_mem>>
    %11 = tpu.memref_squeeze %10 : memref<1x!tpu.dma_semaphore, #tpu.memory_space<semaphore_mem>> -> memref<!tpu.dma_semaphore, #tpu.memory_space<semaphore_mem>>
    tpu.wait_dma2 semaphore(%11 : memref<!tpu.dma_semaphore, #tpu.memory_space<semaphore_mem>>) src(%8 : memref<128x128xbf16, #tpu.memory_space<any>>) dst(%9 : memref<128x128xbf16, #tpu.memory_space<vmem>>)
    %c0_14 = arith.constant 0 : index
    %c0_15 = arith.constant 0 : index
    %12 = vector.load %arg5[%c0_14, %c0_15] : memref<128x128xbf16, #tpu.memory_space<vmem>>, vector<128x128xbf16>
    %cst_16 = arith.constant dense<0.000000e+00> : vector<128x128xf32>
    %13 = tpu.matmul %12, %0, %cst_16 {dimension_numbers = #tpu.dot_dimension_numbers<[1], [0], [0], [1], [0, 0, 1, 1], [], []>} : vector<128x128xbf16>, vector<128x128xbf16>, vector<128x128xf32> -> vector<128x128xf32>
    %14 = arith.truncf %13 : vector<128x128xf32> to vector<128x128xbf16>
    %c0_17 = arith.constant 0 : index
    %c0_18 = arith.constant 0 : index
    %15 = vector.load %arg6[%c0_17, %c0_18] : memref<128x128xbf16, #tpu.memory_space<vmem>>, vector<128x128xbf16>
    tpu.vector_store %arg6[%c0_17, %c0_18], %14 {strides = array<i32>} : memref<128x128xbf16, #tpu.memory_space<vmem>>, vector<128x128xbf16>,
    %c0_19 = arith.constant 0 : index
    %c0_20 = arith.constant 0 : index
    %16 = vector.load %arg5[%c0_19, %c0_20] : memref<128x128xbf16, #tpu.memory_space<vmem>>, vector<128x128xbf16>
    %c0_21 = arith.constant 0 : index
    %c0_22 = arith.constant 0 : index
    %17 = vector.load %arg6[%c0_21, %c0_22] : memref<128x128xbf16, #tpu.memory_space<vmem>>, vector<128x128xbf16>
    %c0_23 = arith.constant 0 : index
    %c1 = arith.constant 1 : index
    %c0_24 = arith.constant 0 : index
    %c0_25 = arith.constant 0 : index
    %18 = vector.load %arg2[%c0_23, %c1, %c0_24, %c0_25] : memref<2x6x128x128xbf16, #tpu.memory_space<vmem>>, vector<1x1x128x128xbf16>
    %19 = vector.shape_cast %18 : vector<1x1x128x128xbf16> to vector<128x128xbf16>
    %cst_26 = arith.constant dense<0.000000e+00> : vector<128x128xf32>
    %20 = tpu.matmul %17, %19, %cst_26 {dimension_numbers = #tpu.dot_dimension_numbers<[1], [0], [0], [1], [0, 0, 1, 1], [], []>} : vector<128x128xbf16>, vector<128x128xbf16>, vector<128x128xf32> -> vector<128x128xf32>
    %21 = arith.addf %7, %20 : vector<128x128xf32>
    %cst_27 = arith.constant dense<0.000000e+00> : vector<128x128xf32>
    %22 = tpu.matmul %16, %17, %cst_27 {dimension_numbers = #tpu.dot_dimension_numbers<[1], [0], [0], [1], [0, 0, 1, 1], [], []>} : vector<128x128xbf16>, vector<128x128xbf16>, vector<128x128xf32> -> vector<128x128xf32>
    %23 = arith.truncf %22 : vector<128x128xf32> to vector<128x128xbf16>
    %c0_28 = arith.constant 0 : index
    %c2 = arith.constant 2 : index
    %c0_29 = arith.constant 0 : index
    %c0_30 = arith.constant 0 : index
    %24 = vector.load %arg2[%c0_28, %c2, %c0_29, %c0_30] : memref<2x6x128x128xbf16, #tpu.memory_space<vmem>>, vector<1x1x128x128xbf16>
    %25 = vector.shape_cast %24 : vector<1x1x128x128xbf16> to vector<128x128xbf16>
    %cst_31 = arith.constant dense<0.000000e+00> : vector<128x128xf32>
    %26 = tpu.matmul %23, %25, %cst_31 {dimension_numbers = #tpu.dot_dimension_numbers<[1], [0], [0], [1], [0, 0, 1, 1], [], []>} : vector<128x128xbf16>, vector<128x128xbf16>, vector<128x128xf32> -> vector<128x128xf32>
    %27 = arith.addf %21, %26 : vector<128x128xf32>
    %cst_32 = arith.constant dense<0.000000e+00> : vector<128x128xf32>
    %28 = tpu.matmul %16, %23, %cst_32 {dimension_numbers = #tpu.dot_dimension_numbers<[1], [0], [0], [1], [0, 0, 1, 1], [], []>} : vector<128x128xbf16>, vector<128x128xbf16>, vector<128x128xf32> -> vector<128x128xf32>
    %29 = arith.truncf %28 : vector<128x128xf32> to vector<128x128xbf16>
    %c0_33 = arith.constant 0 : index
    %c3 = arith.constant 3 : index
    %c0_34 = arith.constant 0 : index
    %c0_35 = arith.constant 0 : index
    %30 = vector.load %arg2[%c0_33, %c3, %c0_34, %c0_35] : memref<2x6x128x128xbf16, #tpu.memory_space<vmem>>, vector<1x1x128x128xbf16>
    %31 = vector.shape_cast %30 : vector<1x1x128x128xbf16> to vector<128x128xbf16>
    %cst_36 = arith.constant dense<0.000000e+00> : vector<128x128xf32>
    %32 = tpu.matmul %29, %31, %cst_36 {dimension_numbers = #tpu.dot_dimension_numbers<[1], [0], [0], [1], [0, 0, 1, 1], [], []>} : vector<128x128xbf16>, vector<128x128xbf16>, vector<128x128xf32> -> vector<128x128xf32>
    %33 = arith.addf %27, %32 : vector<128x128xf32>
    %cst_37 = arith.constant dense<0.000000e+00> : vector<128x128xf32>
    %34 = tpu.matmul %16, %29, %cst_37 {dimension_numbers = #tpu.dot_dimension_numbers<[1], [0], [0], [1], [0, 0, 1, 1], [], []>} : vector<128x128xbf16>, vector<128x128xbf16>, vector<128x128xf32> -> vector<128x128xf32>
    %35 = arith.truncf %34 : vector<128x128xf32> to vector<128x128xbf16>
    %c0_38 = arith.constant 0 : index
    %c4 = arith.constant 4 : index
    %c0_39 = arith.constant 0 : index
    %c0_40 = arith.constant 0 : index
    %36 = vector.load %arg2[%c0_38, %c4, %c0_39, %c0_40] : memref<2x6x128x128xbf16, #tpu.memory_space<vmem>>, vector<1x1x128x128xbf16>
    %37 = vector.shape_cast %36 : vector<1x1x128x128xbf16> to vector<128x128xbf16>
    %cst_41 = arith.constant dense<0.000000e+00> : vector<128x128xf32>
    %38 = tpu.matmul %35, %37, %cst_41 {dimension_numbers = #tpu.dot_dimension_numbers<[1], [0], [0], [1], [0, 0, 1, 1], [], []>} : vector<128x128xbf16>, vector<128x128xbf16>, vector<128x128xf32> -> vector<128x128xf32>
    %39 = arith.addf %33, %38 : vector<128x128xf32>
    %cst_42 = arith.constant dense<0.000000e+00> : vector<128x128xf32>
    %40 = tpu.matmul %16, %35, %cst_42 {dimension_numbers = #tpu.dot_dimension_numbers<[1], [0], [0], [1], [0, 0, 1, 1], [], []>} : vector<128x128xbf16>, vector<128x128xbf16>, vector<128x128xf32> -> vector<128x128xf32>
    %41 = arith.truncf %40 : vector<128x128xf32> to vector<128x128xbf16>
    %c0_43 = arith.constant 0 : index
    %c5 = arith.constant 5 : index
    %c0_44 = arith.constant 0 : index
    %c0_45 = arith.constant 0 : index
    %42 = vector.load %arg2[%c0_43, %c5, %c0_44, %c0_45] : memref<2x6x128x128xbf16, #tpu.memory_space<vmem>>, vector<1x1x128x128xbf16>
    %43 = vector.shape_cast %42 : vector<1x1x128x128xbf16> to vector<128x128xbf16>
    %cst_46 = arith.constant dense<0.000000e+00> : vector<128x128xf32>
    %44 = tpu.matmul %41, %43, %cst_46 {dimension_numbers = #tpu.dot_dimension_numbers<[1], [0], [0], [1], [0, 0, 1, 1], [], []>} : vector<128x128xbf16>, vector<128x128xbf16>, vector<128x128xf32> -> vector<128x128xf32>
    %45 = arith.addf %39, %44 : vector<128x128xf32>
    %c0_47 = arith.constant 0 : index
    %c0_48 = arith.constant 0 : index
    %c0_49 = arith.constant 0 : index
    %46 = vector.load %arg3[%c0_47, %c0_48, %c0_49] : memref<2x1x128xf32, #tpu.memory_space<vmem>>, vector<1x1x128xf32>
    %47 = vector.shape_cast %46 : vector<1x1x128xf32> to vector<1x128xf32>
    %48 = vector.broadcast %47 : vector<1x128xf32> to vector<128x128xf32>
    %49 = arith.addf %45, %48 : vector<128x128xf32>
    %cst_50 = arith.constant 0.000000e+00 : f32
    %50 = vector.broadcast %cst_50 : f32 to vector<128x128xf32>
    %51 = arith.cmpf oge, %49, %50 : vector<128x128xf32>
    %cst_51 = arith.constant 0.00999999977 : f32
    %52 = vector.broadcast %cst_51 : f32 to vector<128x128xf32>
    %53 = arith.mulf %52, %49 : vector<128x128xf32>
    %54 = arith.select %51, %49, %53 : vector<128x128xi1>, vector<128x128xf32>
    %55 = arith.truncf %54 : vector<128x128xf32> to vector<128x128xbf16>
    %c1_52 = arith.constant 1 : index
    %c0_53 = arith.constant 0 : index
    %c0_54 = arith.constant 0 : index
    %c0_55 = arith.constant 0 : index
    %56 = vector.load %arg2[%c1_52, %c0_53, %c0_54, %c0_55] : memref<2x6x128x128xbf16, #tpu.memory_space<vmem>>, vector<1x1x128x128xbf16>
    %57 = vector.shape_cast %56 : vector<1x1x128x128xbf16> to vector<128x128xbf16>
    %cst_56 = arith.constant dense<0.000000e+00> : vector<128x128xf32>
    %58 = tpu.matmul %55, %57, %cst_56 {dimension_numbers = #tpu.dot_dimension_numbers<[1], [0], [0], [1], [0, 0, 1, 1], [], []>} : vector<128x128xbf16>, vector<128x128xbf16>, vector<128x128xf32> -> vector<128x128xf32>
    %cst_57 = arith.constant dense<0.000000e+00> : vector<128x128xf32>
    %59 = tpu.matmul %16, %55, %cst_57 {dimension_numbers = #tpu.dot_dimension_numbers<[1], [0], [0], [1], [0, 0, 1, 1], [], []>} : vector<128x128xbf16>, vector<128x128xbf16>, vector<128x128xf32> -> vector<128x128xf32>
    %60 = arith.truncf %59 : vector<128x128xf32> to vector<128x128xbf16>
    %c1_58 = arith.constant 1 : index
    %c1_59 = arith.constant 1 : index
    %c0_60 = arith.constant 0 : index
    %c0_61 = arith.constant 0 : index
    %61 = vector.load %arg2[%c1_58, %c1_59, %c0_60, %c0_61] : memref<2x6x128x128xbf16, #tpu.memory_space<vmem>>, vector<1x1x128x128xbf16>
    %62 = vector.shape_cast %61 : vector<1x1x128x128xbf16> to vector<128x128xbf16>
    %cst_62 = arith.constant dense<0.000000e+00> : vector<128x128xf32>
    %63 = tpu.matmul %60, %62, %cst_62 {dimension_numbers = #tpu.dot_dimension_numbers<[1], [0], [0], [1], [0, 0, 1, 1], [], []>} : vector<128x128xbf16>, vector<128x128xbf16>, vector<128x128xf32> -> vector<128x128xf32>
    %64 = arith.addf %58, %63 : vector<128x128xf32>
    %cst_63 = arith.constant dense<0.000000e+00> : vector<128x128xf32>
    %65 = tpu.matmul %16, %60, %cst_63 {dimension_numbers = #tpu.dot_dimension_numbers<[1], [0], [0], [1], [0, 0, 1, 1], [], []>} : vector<128x128xbf16>, vector<128x128xbf16>, vector<128x128xf32> -> vector<128x128xf32>
    %66 = arith.truncf %65 : vector<128x128xf32> to vector<128x128xbf16>
    %c1_64 = arith.constant 1 : index
    %c2_65 = arith.constant 2 : index
    %c0_66 = arith.constant 0 : index
    %c0_67 = arith.constant 0 : index
    %67 = vector.load %arg2[%c1_64, %c2_65, %c0_66, %c0_67] : memref<2x6x128x128xbf16, #tpu.memory_space<vmem>>, vector<1x1x128x128xbf16>
    %68 = vector.shape_cast %67 : vector<1x1x128x128xbf16> to vector<128x128xbf16>
    %cst_68 = arith.constant dense<0.000000e+00> : vector<128x128xf32>
    %69 = tpu.matmul %66, %68, %cst_68 {dimension_numbers = #tpu.dot_dimension_numbers<[1], [0], [0], [1], [0, 0, 1, 1], [], []>} : vector<128x128xbf16>, vector<128x128xbf16>, vector<128x128xf32> -> vector<128x128xf32>
    %70 = arith.addf %64, %69 : vector<128x128xf32>
    %cst_69 = arith.constant dense<0.000000e+00> : vector<128x128xf32>
    %71 = tpu.matmul %16, %66, %cst_69 {dimension_numbers = #tpu.dot_dimension_numbers<[1], [0], [0], [1], [0, 0, 1, 1], [], []>} : vector<128x128xbf16>, vector<128x128xbf16>, vector<128x128xf32> -> vector<128x128xf32>
    %72 = arith.truncf %71 : vector<128x128xf32> to vector<128x128xbf16>
    %c1_70 = arith.constant 1 : index
    %c3_71 = arith.constant 3 : index
    %c0_72 = arith.constant 0 : index
    %c0_73 = arith.constant 0 : index
    %73 = vector.load %arg2[%c1_70, %c3_71, %c0_72, %c0_73] : memref<2x6x128x128xbf16, #tpu.memory_space<vmem>>, vector<1x1x128x128xbf16>
    %74 = vector.shape_cast %73 : vector<1x1x128x128xbf16> to vector<128x128xbf16>
    %cst_74 = arith.constant dense<0.000000e+00> : vector<128x128xf32>
    %75 = tpu.matmul %72, %74, %cst_74 {dimension_numbers = #tpu.dot_dimension_numbers<[1], [0], [0], [1], [0, 0, 1, 1], [], []>} : vector<128x128xbf16>, vector<128x128xbf16>, vector<128x128xf32> -> vector<128x128xf32>
    %76 = arith.addf %70, %75 : vector<128x128xf32>
    %cst_75 = arith.constant dense<0.000000e+00> : vector<128x128xf32>
    %77 = tpu.matmul %16, %72, %cst_75 {dimension_numbers = #tpu.dot_dimension_numbers<[1], [0], [0], [1], [0, 0, 1, 1], [], []>} : vector<128x128xbf16>, vector<128x128xbf16>, vector<128x128xf32> -> vector<128x128xf32>
    %78 = arith.truncf %77 : vector<128x128xf32> to vector<128x128xbf16>
    %c1_76 = arith.constant 1 : index
    %c4_77 = arith.constant 4 : index
    %c0_78 = arith.constant 0 : index
    %c0_79 = arith.constant 0 : index
    %79 = vector.load %arg2[%c1_76, %c4_77, %c0_78, %c0_79] : memref<2x6x128x128xbf16, #tpu.memory_space<vmem>>, vector<1x1x128x128xbf16>
    %80 = vector.shape_cast %79 : vector<1x1x128x128xbf16> to vector<128x128xbf16>
    %cst_80 = arith.constant dense<0.000000e+00> : vector<128x128xf32>
    %81 = tpu.matmul %78, %80, %cst_80 {dimension_numbers = #tpu.dot_dimension_numbers<[1], [0], [0], [1], [0, 0, 1, 1], [], []>} : vector<128x128xbf16>, vector<128x128xbf16>, vector<128x128xf32> -> vector<128x128xf32>
    %82 = arith.addf %76, %81 : vector<128x128xf32>
    %cst_81 = arith.constant dense<0.000000e+00> : vector<128x128xf32>
    %83 = tpu.matmul %16, %78, %cst_81 {dimension_numbers = #tpu.dot_dimension_numbers<[1], [0], [0], [1], [0, 0, 1, 1], [], []>} : vector<128x128xbf16>, vector<128x128xbf16>, vector<128x128xf32> -> vector<128x128xf32>
    %84 = arith.truncf %83 : vector<128x128xf32> to vector<128x128xbf16>
    %c1_82 = arith.constant 1 : index
    %c5_83 = arith.constant 5 : index
    %c0_84 = arith.constant 0 : index
    %c0_85 = arith.constant 0 : index
    %85 = vector.load %arg2[%c1_82, %c5_83, %c0_84, %c0_85] : memref<2x6x128x128xbf16, #tpu.memory_space<vmem>>, vector<1x1x128x128xbf16>
    %86 = vector.shape_cast %85 : vector<1x1x128x128xbf16> to vector<128x128xbf16>
    %cst_86 = arith.constant dense<0.000000e+00> : vector<128x128xf32>
    %87 = tpu.matmul %84, %86, %cst_86 {dimension_numbers = #tpu.dot_dimension_numbers<[1], [0], [0], [1], [0, 0, 1, 1], [], []>} : vector<128x128xbf16>, vector<128x128xbf16>, vector<128x128xf32> -> vector<128x128xf32>
    %88 = arith.addf %82, %87 : vector<128x128xf32>
    %c1_87 = arith.constant 1 : index
    %c0_88 = arith.constant 0 : index
    %c0_89 = arith.constant 0 : index
    %89 = vector.load %arg3[%c1_87, %c0_88, %c0_89] : memref<2x1x128xf32, #tpu.memory_space<vmem>>, vector<1x1x128xf32>
    %90 = vector.shape_cast %89 : vector<1x1x128xf32> to vector<1x128xf32>
    %91 = vector.broadcast %90 : vector<1x128xf32> to vector<128x128xf32>
    %92 = arith.addf %88, %91 : vector<128x128xf32>
    %cst_90 = arith.constant 0.000000e+00 : f32
    %93 = vector.broadcast %cst_90 : f32 to vector<128x128xf32>
    %94 = arith.cmpf oge, %92, %93 : vector<128x128xf32>
    %cst_91 = arith.constant 0.00999999977 : f32
    %95 = vector.broadcast %cst_91 : f32 to vector<128x128xf32>
    %96 = arith.mulf %95, %92 : vector<128x128xf32>
    %97 = arith.select %94, %92, %96 : vector<128x128xi1>, vector<128x128xf32>
    %c0_92 = arith.constant 0 : index
    %c0_93 = arith.constant 0 : index
    %98 = vector.load %arg4[%c0_92, %c0_93] : memref<128x128xf32, #tpu.memory_space<vmem>>, vector<128x128xf32>
    tpu.vector_store %arg4[%c0_92, %c0_93], %97 {strides = array<i32>} : memref<128x128xf32, #tpu.memory_space<vmem>>, vector<128x128xf32>,
    return
  }
}

</mosaic_0001>

<bundles_post_ra>
// kernel: tpu_custom_call.1
= control target key start
LH: loop header
LB: loop body
LE: loop exit
PB: predicated region body
PF: predicated region fallthrough
CT: control target
= control target key end

     0   :  { %9 = vsyncpa [#allocation6], 0  ;;  %s5837_s0 = inlined_call_operand.hbm [shape: bf16[128,128], index: 0, kind: input, shape index: {}]   ;;  %s5838_s1 = inlined_call_operand.hbm [shape: bf16[128,128], index: 1, kind: input, shape index: {}]   ;;  %s5839_s2 = inlined_call_operand.hbm [shape: bf16[2,6,128,128], index: 2, kind: input, shape index: {}]   ;;  %s5840_s3 = inlined_call_operand.vmem [shape: f32[2,1,128], index: 3, kind: input, shape index: {}]   ;;  %s5841_s4 = inlined_call_operand.hbm [shape: f32[128,128], index: 4, kind: output, shape index: {}]  }
   0x1   :  { %10 = vsyncpa [#allocation9], 0 }
   0x2   :  { %11 = vsyncpa [#allocation7], 0  ;;  %s5191_s15 = smov [#allocation5]  }
   0x3   :  { %s17_s16 = sshll.u32 %s5191_s15, 4  ;;  %s18_s16 = int_to_ptr.vmem [resolvable:$true] %s17_s16 }
   0x4   :  { %s5111_s17 = scalar_lea.vmem %s18_s16, 1024  ;;  %p5116_p1 = scmp.lt.s32.totalorder %s18_s16, %s18_s16 }
   0x5   :  { %p5112_p0 = scmp.ne.s32.totalorder %s18_s16, %s5111_s17  ;;  %p5117_p2 = scmp.lt.s32.totalorder %s5111_s17, %s5111_s17 }
   0x7   :  { %p5118_p3 = por %p5117_p2, %p5116_p1 }
   0x9   :  { %p5119_p4 = pnand %p5118_p3, %p5112_p0 }
   0xb   :  { %5122 = shalt.err (!%p5119_p4)
}
   0xc   :  { %s5192_s18 = smov 64   ;;  %s5193_s19 = smov 4  }
   0xd   :  { %23 = dma.hbm_to_vmem [thread:$0]  %s5838_s1, 1024, %s18_s16, [#allocation6], %s5192_s18, %s5192_s18, %s5193_s19  }
   0xe   :  { %s5194_s22 = smov [#allocation8]  }
   0xf   :  { %s29_s23 = sshll.u32 %s5194_s22, 4  ;;  %s30_s23 = int_to_ptr.vmem [resolvable:$true] %s29_s23 }
  0x10   :  { %s5131_s24 = scalar_lea.vmem %s30_s23, 12288  ;;  %p5136_p6 = scmp.lt.s32.totalorder %s30_s23, %s30_s23 }
  0x11   :  { %p5132_p5 = scmp.ne.s32.totalorder %s30_s23, %s5131_s24  ;;  %p5137_p7 = scmp.lt.s32.totalorder %s5131_s24, %s5131_s24 }
  0x13   :  { %p5138_p8 = por %p5137_p7, %p5136_p6 }
  0x15   :  { %p5139_p9 = pnand %p5138_p8, %p5132_p5 }
  0x17   :  { %5142 = shalt.err (!%p5139_p9)
}
  0x18   :  { %35 = dma.hbm_to_vmem [thread:$0]  %s5839_s2, 12288, %s30_s23, [#allocation9], %s5192_s18, %s5192_s18, %s5193_s19  }
  0x19   :  { %5183 = dma.done.wait [#allocation6], 1024  }
  0x1a   :  { %5184 = vsyncadd [#allocation6], 4294966272 }
  0x1b   :  { %5185 = dma.done.wait [#allocation9], 12288  }
  0x1c   :  { %5186 = vsyncadd [#allocation9], 4294955008  ;;  %s5195_s27 = smov [#allocation2]  }
  0x1d   :  { %s68_s1 = sshll.u32 %s5195_s27, 4  ;;  %s69_s1 = int_to_ptr.vmem [resolvable:$true] %s68_s1 }
  0x1e   :  { %s5151_s28 = scalar_lea.vmem %s69_s1, 1024  ;;  %p5156_p11 = scmp.lt.s32.totalorder %s69_s1, %s69_s1 }
  0x1f   :  { %p5152_p10 = scmp.ne.s32.totalorder %s69_s1, %s5151_s28  ;;  %p5157_p12 = scmp.lt.s32.totalorder %s5151_s28, %s5151_s28 }
  0x21   :  { %p5158_p13 = por %p5157_p12, %p5156_p11 }
  0x23   :  { %p5159_p0 = pnand %p5158_p13, %p5152_p10 }
  0x25   :  { %5162 = shalt.err (!%p5159_p0)  }
  0x26   :  { %71 = dma.hbm_to_vmem [thread:$0]  %s5837_s0, 1024, %s69_s1, [#allocation4]  ;;  %v5233_v0 = vld [vmem:[#allocation5] sm:$0xf]  ;;  %v5235_v1 = vld [vmem:[#allocation5 + $0x4] sm:$0xf] }
  0x27   :  { %v47_v2 = vld [vmem:[#allocation5 + $0x8] sm:$0xf]  ;;  %v48_v3 = vld [vmem:[#allocation5 + $0xc] sm:$0xf]  ;;  %v49_v4 = vld [vmem:[#allocation5 + $0x10] sm:$0xf] }
  0x28   :  { %v50_v5 = vld [vmem:[#allocation5 + $0x14] sm:$0xf]  ;;  %v51_v6 = vld [vmem:[#allocation5 + $0x18] sm:$0xf]  ;;  %v52_v7 = vld [vmem:[#allocation5 + $0x1c] sm:$0xf] }
  0x29   :  { %v53_v8 = vld [vmem:[#allocation5 + $0x20] sm:$0xf]  ;;  %v54_v9 = vld [vmem:[#allocation5 + $0x24] sm:$0xf]  ;;  %v55_v10 = vld [vmem:[#allocation5 + $0x28] sm:$0xf] }
  0x2a   :  { %v56_v11 = vld [vmem:[#allocation5 + $0x2c] sm:$0xf]  ;;  %v57_v12 = vld [vmem:[#allocation5 + $0x30] sm:$0xf]  ;;  %v58_v13 = vld [vmem:[#allocation5 + $0x34] sm:$0xf] }
  0x2b   :  { %v59_v14 = vld [vmem:[#allocation5 + $0x38] sm:$0xf]  ;;  %v60_v15 = vld [vmem:[#allocation5 + $0x3c] sm:$0xf]  ;;  %v5237_v16 = vld [vmem:[#allocation8] sm:$0xf]  ;;  %v5259_v33 = vcombine.low %v57_v12, %v58_v13 }
  0x2c   :  { %v5239_v17 = vld [vmem:[#allocation8 + $0x4] sm:$0xf]  ;;  %v5241_v18 = vld [vmem:[#allocation8 + $0x8] sm:$0xf]  ;;  %v5243_v19 = vld [vmem:[#allocation8 + $0xc] sm:$0xf]  ;;  %v5257_v32 = vcombine.low %v59_v14, %v60_v15 }
  0x2d   :  { %v5245_v20 = vld [vmem:[#allocation8 + $0x10] sm:$0xf]  ;;  %v5247_v21 = vld [vmem:[#allocation8 + $0x14] sm:$0xf]  ;;  %v5249_v22 = vld [vmem:[#allocation8 + $0x18] sm:$0xf] }
  0x2e   :  { %v5251_v23 = vld [vmem:[#allocation8 + $0x1c] sm:$0xf]  ;;  %v5253_v24 = vld [vmem:[#allocation8 + $0x20] sm:$0xf]  ;;  %v5255_v25 = vld [vmem:[#allocation8 + $0x24] sm:$0xf] }
  0x2f   :  { %v82_v26 = vld [vmem:[#allocation8 + $0x28] sm:$0xf]  ;;  %v83_v27 = vld [vmem:[#allocation8 + $0x2c] sm:$0xf]  ;;  %v84_v28 = vld [vmem:[#allocation8 + $0x30] sm:$0xf] }
  0x30   :  { %v85_v29 = vld [vmem:[#allocation8 + $0x34] sm:$0xf]  ;;  %v86_v30 = vld [vmem:[#allocation8 + $0x38] sm:$0xf]  ;;  %v87_v31 = vld [vmem:[#allocation8 + $0x3c] sm:$0xf] }
  0x31   :  { %5187 = dma.done.wait [#allocation4], 1024 }
  0x32   :  { %5188 = vsyncadd [#allocation4], 4294966272  ;;  %4271 = vmatprep.subr.bf16.mxu0 %v5257_v32  ;;  %v5264_v34 = vcombine.low %v55_v10, %v56_v11  ;;  %v4983_v35 = vld [vmem:[#allocation2] sm:$0xff]   ;;  %v5268_v36 = vcombine.low %v53_v8, %v54_v9  ;;  %v5272_v37 = vcombine.low %v51_v6, %v52_v7  ;;  %v4991_v38 = vld [vmem:[#allocation8 + $0x78] sm:$0xff]   ;;  %v5276_v39 = vcombine.low %v49_v4, %v50_v5 }
  0x33   :  { %4272 = vmatpush3.bf16.msra.mxu0 %v5257_v32  ;;  %4287 = vmatprep.mubr.bf16.mxu0 %v4983_v35  ;;  %v4992_v40 = vld [vmem:[#allocation8 + $0x70] sm:$0xff]   ;;  %v4993_v41 = vld [vmem:[#allocation8 + $0x68] sm:$0xff]   ;;  %v5280_v42 = vcombine.low %v47_v2, %v48_v3  ;;  %v3715_v43 = vcombine.low %v5233_v0, %v5235_v1  ;;  %v3762_v45 = vcombine.low %v86_v30, %v87_v31  ;;  %v4986_v48 = vld [vmem:[#allocation2 + $0x18] sm:$0xff]  }
  0x34   :  { %4273 = vmatprep.subr.bf16.mxu0 %v5259_v33  ;;  %4303 = vmatprep.subr.bf16.mxu1 %v4991_v38  ;;  %v4984_v44 = vld [vmem:[#allocation2 + $0x8] sm:$0xff]   ;;  %v4985_v46 = vld [vmem:[#allocation2 + $0x10] sm:$0xff]   ;;  %v3761_v47 = vcombine.low %v84_v28, %v85_v29  ;;  %v3760_v49 = vcombine.low %v82_v26, %v83_v27  ;;  %v4987_v50 = vld [vmem:[#allocation2 + $0x20] sm:$0xff]   ;;  %v3759_v55 = vcombine.low %v5253_v24, %v5255_v25 }
  0x35   :  { %4304 = vmatpush3.bf16.msra.mxu1 %v4991_v38  ;;  %v4988_v51 = vld [vmem:[#allocation2 + $0x28] sm:$0xff]   ;;  %v4989_v52 = vld [vmem:[#allocation2 + $0x30] sm:$0xff]   ;;  %v4990_v53 = vld [vmem:[#allocation2 + $0x38] sm:$0xff]   ;;  %v3758_v57 = vcombine.low %v5249_v22, %v5251_v23  ;;  %v3757_v59 = vcombine.low %v5245_v20, %v5247_v21  ;;  %v3756_v61 = vcombine.low %v5241_v18, %v5243_v19  ;;  %v3755_v63 = vcombine.low %v5237_v16, %v5239_v17 }
  0x36   :  { %4305 = vmatprep.subr.bf16.mxu1 %v4992_v40  ;;  %v4994_v54 = vld [vmem:[#allocation8 + $0x60] sm:$0xff]   ;;  %v4995_v56 = vld [vmem:[#allocation8 + $0x58] sm:$0xff]   ;;  %v4996_v58 = vld [vmem:[#allocation8 + $0x50] sm:$0xff]  }
  0x37   :  { %4274 = vmatpush3.bf16.msra.mxu0 %v5259_v33  ;;  %v4997_v60 = vld [vmem:[#allocation8 + $0x48] sm:$0xff]   ;;  %v4998_v62 = vld [vmem:[#allocation8 + $0x40] sm:$0xff]   ;;  %v5313_v35 = vld [vmem:[#allocation2 + $0x18] sm:$0xff]  }
  0x38   :  { %4275 = vmatprep.subr.bf16.mxu0 %v5264_v34  ;;  %v5304_v31 = vld [vmem:[#allocation2] sm:$0xff]   ;;  %v5321_v38 = vld [vmem:[#allocation2 + $0x30] sm:$0xff]  }
  0x39   :  { %4306 = vmatpush3.bf16.msra.mxu1 %v4992_v40  ;;  %v5015_v40 = vld [vmem:[#allocation8 + $0xb8] sm:$0xff]  }
  0x3a   :  { %4307 = vmatprep.subr.bf16.mxu1 %v4993_v41 }
  0x3b   :  { %4276 = vmatpush3.bf16.msra.mxu0 %v5264_v34 }
  0x3c   :  { %4277 = vmatprep.subr.bf16.mxu0 %v5268_v36 }
  0x3d   :  { %4308 = vmatpush3.bf16.msra.mxu1 %v4993_v41  ;;  %v5016_v41 = vld [vmem:[#allocation8 + $0xb0] sm:$0xff]  }
  0x3e   :  { %4309 = vmatprep.subr.bf16.mxu1 %v4994_v54 }
  0x3f   :  { %4278 = vmatpush3.bf16.msra.mxu0 %v5268_v36 }
  0x40   :  { %4279 = vmatprep.subr.bf16.mxu0 %v5272_v37 }
  0x41   :  { %4310 = vmatpush3.bf16.msra.mxu1 %v4994_v54 }
  0x42   :  { %4311 = vmatprep.subr.bf16.mxu1 %v4995_v56 }
  0x43   :  { %4280 = vmatpush3.bf16.msra.mxu0 %v5272_v37 }
  0x44   :  { %4281 = vmatprep.subr.bf16.mxu0 %v5276_v39 }
  0x45   :  { %4312 = vmatpush3.bf16.msra.mxu1 %v4995_v56 }
  0x46   :  { %4313 = vmatprep.subr.bf16.mxu1 %v4996_v58 }
  0x47   :  { %4282 = vmatpush3.bf16.msra.mxu0 %v5276_v39 }
  0x48   :  { %4283 = vmatprep.subr.bf16.mxu0 %v5280_v42 }
  0x49   :  { %4314 = vmatpush3.bf16.msra.mxu1 %v4996_v58 }
  0x4a   :  { %4315 = vmatprep.subr.bf16.mxu1 %v4997_v60 }
  0x4b   :  { %4284 = vmatpush3.bf16.msra.mxu0 %v5280_v42 }
  0x4c   :  { %4285 = vmatprep.subr.bf16.mxu0 %v3715_v43 }
  0x4d   :  { %4316 = vmatpush3.bf16.msra.mxu1 %v4997_v60 }
  0x4e   :  { %4317 = vmatprep.subr.bf16.mxu1 %v4998_v62 }
  0x4f   :  { %4286 = vmatpush3.bf16.msra.mxu0 %v3715_v43 }
  0x50   :  { %4335 = vmatprep.subr.bf16.mxu0 %v3762_v45 }
  0x51   :  { %4318 = vmatpush3.bf16.msra.mxu1 %v4998_v62 }
  0x52   :  { %4288 = vmatmul.mubr.bf16.vlgmr.msra.gmra.mxu0 %v4984_v44  ;;  %v5019_v44 = vld [vmem:[#allocation8 + $0x98] sm:$0xff]  }
  0x53   :  { %4291 = vmatprep.mubr.bf16.mxu0 %v4985_v46  ;;  %4336 = vmatpush3.bf16.msra.mxu0 %v3762_v45  ;;  %v5020_v45 = vld [vmem:[#allocation8 + $0x90] sm:$0xff]   ;;  %v5021_v46 = vld [vmem:[#allocation8 + $0x88] sm:$0xff]  }
  0x54   :  { %4337 = vmatprep.subr.bf16.mxu0 %v3761_v47 }
  0x57   :  { %4338 = vmatpush3.bf16.msra.mxu0 %v3761_v47  ;;  %v5022_v47 = vld [vmem:[#allocation8 + $0x80] sm:$0xff]  }
  0x58   :  { %4339 = vmatprep.subr.bf16.mxu0 %v3760_v49 }
  0x5a   :  { %4292 = vmatmul.mubr.bf16.gmra.mxu0 %v4986_v48 }
  0x5b   :  { %4295 = vmatprep.mubr.bf16.mxu0 %v4987_v50  ;;  %4340 = vmatpush3.bf16.msra.mxu0 %v3760_v49 }
  0x5c   :  { %4341 = vmatprep.subr.bf16.mxu0 %v3759_v55 }
  0x5f   :  { %4342 = vmatpush3.bf16.msra.mxu0 %v3759_v55 }
  0x60   :  { %4343 = vmatprep.subr.bf16.mxu0 %v3758_v57 }
  0x62   :  { %4296 = vmatmul.mubr.bf16.gmra.mxu0 %v4988_v51 }
  0x63   :  { %4299 = vmatprep.mubr.bf16.mxu0 %v4989_v52  ;;  %4344 = vmatpush3.bf16.msra.mxu0 %v3758_v57 }
  0x64   :  { %4345 = vmatprep.subr.bf16.mxu0 %v3757_v59 }
  0x67   :  { %4346 = vmatpush3.bf16.msra.mxu0 %v3757_v59 }
  0x68   :  { %4347 = vmatprep.subr.bf16.mxu0 %v3756_v61 }
  0x6a   :  { %4300 = vmatmul.mubr.bf16.gmra.mxu0 %v4990_v53 }
  0x6b   :  { %4351 = vmatprep.mubr.bf16.mxu0 %v3715_v43  ;;  %4348 = vmatpush3.bf16.msra.mxu0 %v3756_v61  ;;  %v5018_v43 = vld [vmem:[#allocation8 + $0xa0] sm:$0xff]  }
  0x6c   :  { %4349 = vmatprep.subr.bf16.mxu0 %v3755_v63 }
  0x6f   :  { %4350 = vmatpush3.bf16.msra.mxu0 %v3755_v63 }
  0x70   :  { %4399 = vmatprep.subr.bf16.mxu0 %v5015_v40 }
  0x72   :  { %4352 = vmatmul.mubr.bf16.vlgmr.msra.gmra.mxu0 %v5280_v42  ;;  %v5017_v42 = vld [vmem:[#allocation8 + $0xa8] sm:$0xff]  }
  0x73   :  { %4355 = vmatprep.mubr.bf16.mxu0 %v5276_v39  ;;  %v5325_v39 = vld [vmem:[#allocation2 + $0x38] sm:$0xff]   ;;  %4400 = vmatpush3.bf16.msra.mxu0 %v5015_v40 }
  0x74   :  { %4401 = vmatprep.subr.bf16.mxu0 %v5016_v41 }
  0x77   :  { %4402 = vmatpush3.bf16.msra.mxu0 %v5016_v41 }
  0x78   :  { %4403 = vmatprep.subr.bf16.mxu0 %v5017_v42 }
  0x7a   :  { %4356 = vmatmul.mubr.bf16.gmra.mxu0 %v5272_v37  ;;  %v5319_v37 = vld [vmem:[#allocation2 + $0x28] sm:$0xff]  }
  0x7b   :  { %4359 = vmatprep.mubr.bf16.mxu0 %v5268_v36  ;;  %v5315_v36 = vld [vmem:[#allocation2 + $0x20] sm:$0xff]   ;;  %4404 = vmatpush3.bf16.msra.mxu0 %v5017_v42 }
  0x7c   :  { %4405 = vmatprep.subr.bf16.mxu0 %v5018_v43 }
  0x7f   :  { %4406 = vmatpush3.bf16.msra.mxu0 %v5018_v43 }
  0x80   :  { %4407 = vmatprep.subr.bf16.mxu0 %v5019_v44 }
  0x82   :  { %4360 = vmatmul.mubr.bf16.gmra.mxu0 %v5264_v34  ;;  %v5309_v34 = vld [vmem:[#allocation2 + $0x10] sm:$0xff]  }
  0x83   :  { %4363 = vmatprep.mubr.bf16.mxu0 %v5259_v33  ;;  %v5307_v33 = vld [vmem:[#allocation2 + $0x8] sm:$0xff]   ;;  %4408 = vmatpush3.bf16.msra.mxu0 %v5019_v44 }
  0x84   :  { %4409 = vmatprep.subr.bf16.mxu0 %v5020_v45 }
  0x87   :  { %4410 = vmatpush3.bf16.msra.mxu0 %v5020_v45 }
  0x88   :  { %4411 = vmatprep.subr.bf16.mxu0 %v5021_v46 }
  0x8a   :  { %4364 = vmatmul.mubr.bf16.gmra.mxu0 %v5257_v32 }
  0x8b   :  { %4412 = vmatpush3.bf16.msra.mxu0 %v5021_v46 }
  0x8c   :  { %4413 = vmatprep.subr.bf16.mxu0 %v5022_v47 }
  0x8f   :  { %4414 = vmatpush3.bf16.msra.mxu0 %v5022_v47 }
 0x112   :  { %v4289_v0 = vpop.f32.mrf.mxu0 }
 0x114   :  { %v238_v1 = vpop.f32.mrf.mxu0 }
 0x116   :  { %v4290_v2 = vpop.f32.mrf.mxu0 }
 0x117   :  { %v3880_v3 = vpack.c.bf16 %v4290_v2, %v4289_v0 }
 0x118   :  { %v241_v4 = vpop.f32.mrf.mxu0 }
 0x119   :  { %3912 = vst [vmem:[#allocation3 + $0x8] sm:$0xff] %v3880_v3   ;;  %v3875_v5 = vpack.c.bf16 %v241_v4, %v238_v1 }
 0x11a   :  { %v4293_v6 = vpop.f32.mrf.mxu0 }
 0x11b   :  { %3876 = vst [vmem:[#allocation3] sm:$0xff] %v3875_v5  }
 0x11c   :  { %v254_v7 = vpop.f32.mrf.mxu0 }
 0x11e   :  { %v4294_v8 = vpop.f32.mrf.mxu0 }
 0x11f   :  { %v3890_v9 = vpack.c.bf16 %v4294_v8, %v4293_v6 }
 0x120   :  { %v257_v10 = vpop.f32.mrf.mxu0  ;;  %v5000_v14 = vld [vmem:[#allocation3 + $0x8] sm:$0xff]  }
 0x121   :  { %3914 = vst [vmem:[#allocation3 + $0x18] sm:$0xff] %v3890_v9   ;;  %v3885_v11 = vpack.c.bf16 %v257_v10, %v254_v7 }
 0x122   :  { %v4297_v12 = vpop.f32.mrf.mxu0  ;;  %v4999_v13 = vld [vmem:[#allocation3] sm:$0xff]  }
 0x123   :  { %3913 = vst [vmem:[#allocation3 + $0x10] sm:$0xff] %v3885_v11   ;;  %4319 = vmatprep.mubr.bf16.mxu1 %v4999_v13 }
 0x124   :  { %v270_v15 = vpop.f32.mrf.mxu0  ;;  %4320 = vmatmul.mubr.bf16.vlgmr.msra.gmra.mxu1 %v5000_v14 }
 0x126   :  { %v4298_v16 = vpop.f32.mrf.mxu0 }
 0x127   :  { %v3900_v17 = vpack.c.bf16 %v4298_v16, %v4297_v12 }
 0x128   :  { %v273_v18 = vpop.f32.mrf.mxu0  ;;  %v5002_v22 = vld [vmem:[#allocation3 + $0x18] sm:$0xff]  }
 0x129   :  { %3916 = vst [vmem:[#allocation3 + $0x28] sm:$0xff] %v3900_v17   ;;  %v3895_v19 = vpack.c.bf16 %v273_v18, %v270_v15 }
 0x12a   :  { %v4301_v20 = vpop.f32.mrf.mxu0  ;;  %v5001_v21 = vld [vmem:[#allocation3 + $0x10] sm:$0xff]  }
 0x12b   :  { %3915 = vst [vmem:[#allocation3 + $0x20] sm:$0xff] %v3895_v19   ;;  %4323 = vmatprep.mubr.bf16.mxu1 %v5001_v21 }
 0x12c   :  { %v286_v23 = vpop.f32.mrf.mxu0  ;;  %4324 = vmatmul.mubr.bf16.gmra.mxu1 %v5002_v22 }
 0x12e   :  { %v4302_v24 = vpop.f32.mrf.mxu0 }
 0x12f   :  { %v3910_v25 = vpack.c.bf16 %v4302_v24, %v4301_v20  ;;  %v5023_v24 = vld [vmem:[#allocation8 + $0xf8] sm:$0xff]  }
 0x130   :  { %v289_v26 = vpop.f32.mrf.mxu0  ;;  %v5004_v29 = vld [vmem:[#allocation3 + $0x28] sm:$0xff]   ;;  %4463 = vmatprep.subr.bf16.mxu0 %v5023_v24 }
 0x131   :  { %3918 = vst [vmem:[#allocation3 + $0x38] sm:$0xff] %v3910_v25   ;;  %v3905_v27 = vpack.c.bf16 %v289_v26, %v286_v23  ;;  %v5024_v25 = vld [vmem:[#allocation8 + $0xf0] sm:$0xff]   ;;  %v5025_v26 = vld [vmem:[#allocation8 + $0xe8] sm:$0xff]  }
 0x132   :  { %v5003_v28 = vld [vmem:[#allocation3 + $0x20] sm:$0xff]   ;;  %v4353_v40 = vpop.f32.mrf.mxu0 }
 0x133   :  { %3917 = vst [vmem:[#allocation3 + $0x30] sm:$0xff] %v3905_v27   ;;  %4327 = vmatprep.mubr.bf16.mxu1 %v5003_v28  ;;  %v5026_v27 = vld [vmem:[#allocation8 + $0xe0] sm:$0xff]  }
 0x134   :  { %4328 = vmatmul.mubr.bf16.gmra.mxu1 %v5004_v29  ;;  %v705_v41 = vpop.f32.mrf.mxu0 }
 0x136   :  { %v4354_v42 = vpop.f32.mrf.mxu0 }
 0x138   :  { %v5005_v30 = vld [vmem:[#allocation3 + $0x38] sm:$0xff]   ;;  %v5369_v43 = vpop.f32.mrf.mxu0 }
 0x139   :  { %4367 = vmatprep.subr.bf16.mxu1 %v5005_v30 }
 0x13a   :  { %v5006_v32 = vld [vmem:[#allocation3 + $0x30] sm:$0xff]   ;;  %4368 = vmatpush3.bf16.msra.mxu1 %v5005_v30  ;;  %v4357_v44 = vpop.f32.mrf.mxu0 }
 0x13b   :  { %4331 = vmatprep.mubr.bf16.mxu1 %v5006_v32  ;;  %4369 = vmatprep.subr.bf16.mxu1 %v5006_v32 }
 0x13c   :  { %4332 = vmatmul.mubr.bf16.gmra.mxu1 %v5005_v30  ;;  %v5029_v30 = vld [vmem:[#allocation8 + $0xc8] sm:$0xff]   ;;  %v721_v45 = vpop.f32.mrf.mxu0 }
 0x13d   :  { %4383 = vmatprep.mubr.bf16.mxu1 %v5304_v31 }
 0x13e   :  { %4370 = vmatpush3.bf16.msra.mxu1 %v5006_v32  ;;  %v5030_v32 = vld [vmem:[#allocation8 + $0xc0] sm:$0xff]   ;;  %v4358_v46 = vpop.f32.mrf.mxu0 }
 0x13f   :  { %4371 = vmatprep.subr.bf16.mxu1 %v5004_v29 }
 0x140   :  { %v5371_v47 = vpop.f32.mrf.mxu0 }
 0x142   :  { %4372 = vmatpush3.bf16.msra.mxu1 %v5004_v29  ;;  %v5028_v29 = vld [vmem:[#allocation8 + $0xd0] sm:$0xff]  }
 0x143   :  { %4373 = vmatprep.subr.bf16.mxu1 %v5003_v28 }
 0x146   :  { %4374 = vmatpush3.bf16.msra.mxu1 %v5003_v28  ;;  %v5027_v28 = vld [vmem:[#allocation8 + $0xd8] sm:$0xff]  }
 0x147   :  { %4375 = vmatprep.subr.bf16.mxu1 %v5002_v22 }
 0x14a   :  { %4376 = vmatpush3.bf16.msra.mxu1 %v5002_v22 }
 0x14b   :  { %4377 = vmatprep.subr.bf16.mxu1 %v5001_v21 }
 0x14e   :  { %4378 = vmatpush3.bf16.msra.mxu1 %v5001_v21 }
 0x14f   :  { %4379 = vmatprep.subr.bf16.mxu1 %v5000_v14 }
 0x152   :  { %4380 = vmatpush3.bf16.msra.mxu1 %v5000_v14 }
 0x153   :  { %4381 = vmatprep.subr.bf16.mxu1 %v4999_v13 }
 0x156   :  { %4382 = vmatpush3.bf16.msra.mxu1 %v4999_v13 }
 0x159   :  { %4384 = vmatmul.mubr.bf16.vlgmr.msra.gmra.mxu1 %v5307_v33 }
 0x15a   :  { %4387 = vmatprep.mubr.bf16.mxu1 %v5309_v34 }
 0x161   :  { %4388 = vmatmul.mubr.bf16.gmra.mxu1 %v5313_v35 }
 0x162   :  { %4391 = vmatprep.mubr.bf16.mxu1 %v5315_v36 }
 0x169   :  { %4392 = vmatmul.mubr.bf16.gmra.mxu1 %v5319_v37 }
 0x16a   :  { %4395 = vmatprep.mubr.bf16.mxu1 %v5321_v38 }
 0x171   :  { %4396 = vmatmul.mubr.bf16.gmra.mxu1 %v5325_v39 }
 0x172   :  { %4447 = vmatprep.mubr.bf16.mxu1 %v5304_v31 }
 0x1e4   :  { %v5329_v48 = vpop.f32.mrf.mxu1 }
 0x1e6   :  { %v5331_v49 = vpop.f32.mrf.mxu1 }
 0x1e8   :  { %v5333_v50 = vpop.f32.mrf.mxu1 }
 0x1ea   :  { %v5335_v51 = vpop.f32.mrf.mxu1 }
 0x1ec   :  { %v5337_v52 = vpop.f32.mrf.mxu1 }
 0x1ee   :  { %v5339_v53 = vpop.f32.mrf.mxu1 }
 0x1f0   :  { %v5341_v54 = vpop.f32.mrf.mxu1 }
 0x1f2   :  { %v5343_v55 = vpop.f32.mrf.mxu1 }
 0x1f4   :  { %v5345_v56 = vpop.f32.mrf.mxu1 }
 0x1f6   :  { %v5347_v57 = vpop.f32.mrf.mxu1 }
 0x1f8   :  { %v5349_v58 = vpop.f32.mrf.mxu1 }
 0x1fa   :  { %v5351_v59 = vpop.f32.mrf.mxu1 }
 0x1fc   :  { %v5353_v60 = vpop.f32.mrf.mxu1 }
 0x1fe   :  { %v5355_v61 = vpop.f32.mrf.mxu1 }
 0x200   :  { %v5357_v62 = vpop.f32.mrf.mxu1 }
 0x202   :  { %v5359_v63 = vpop.f32.mrf.mxu1 }
 0x219   :  { %v4385_v0 = vpop.f32.mrf.mxu1 }
 0x21b   :  { %v850_v1 = vpop.f32.mrf.mxu1 }
 0x21d   :  { %v4386_v2 = vpop.f32.mrf.mxu1 }
 0x21e   :  { %v914_v5 = vpack.c.bf16 %v4386_v2, %v4385_v0  ;;  %v4361_v0 = vpop.f32.mrf.mxu0 }
 0x21f   :  { %v853_v3 = vpop.f32.mrf.mxu1 }
 0x220   :  { %v913_v4 = vpack.c.bf16 %v853_v3, %v850_v1  ;;  %v737_v1 = vpop.f32.mrf.mxu0 }
 0x221   :  { %v4389_v6 = vpop.f32.mrf.mxu1 }
 0x222   :  { %4415 = vmatprep.mubr.bf16.mxu0 %v913_v4  ;;  %v4362_v2 = vpop.f32.mrf.mxu0 }
 0x223   :  { %v866_v7 = vpop.f32.mrf.mxu1  ;;  %4416 = vmatmul.mubr.bf16.vlgmr.msra.gmra.mxu0 %v914_v5 }
 0x224   :  { %4464 = vmatpush3.bf16.msra.mxu0 %v5023_v24  ;;  %v5373_v3 = vpop.f32.mrf.mxu0 }
 0x225   :  { %v4390_v8 = vpop.f32.mrf.mxu1  ;;  %4465 = vmatprep.subr.bf16.mxu0 %v5024_v25 }
 0x226   :  { %v916_v11 = vpack.c.bf16 %v4390_v8, %v4389_v6  ;;  %v714_v8 = vadd.f32 %v4353_v40, %v5329_v48  ;;  %v722_v48 = vadd.f32 %v721_v45, %v5339_v53 }
 0x227   :  { %v869_v9 = vpop.f32.mrf.mxu1 }
 0x228   :  { %v915_v10 = vpack.c.bf16 %v869_v9, %v866_v7  ;;  %4466 = vmatpush3.bf16.msra.mxu0 %v5024_v25  ;;  %v746_v25 = vadd.f32 %v4361_v0, %v5345_v56 }
 0x229   :  { %v4393_v12 = vpop.f32.mrf.mxu1  ;;  %4467 = vmatprep.subr.bf16.mxu0 %v5025_v26 }
 0x22a   :  { %4419 = vmatprep.mubr.bf16.mxu0 %v915_v10 }
 0x22b   :  { %v882_v13 = vpop.f32.mrf.mxu1  ;;  %4420 = vmatmul.mubr.bf16.gmra.mxu0 %v916_v11 }
 0x22c   :  { %4468 = vmatpush3.bf16.msra.mxu0 %v5025_v26 }
 0x22d   :  { %v4394_v14 = vpop.f32.mrf.mxu1  ;;  %4469 = vmatprep.subr.bf16.mxu0 %v5026_v27 }
 0x22e   :  { %v918_v17 = vpack.c.bf16 %v4394_v14, %v4393_v12 }
 0x22f   :  { %v885_v15 = vpop.f32.mrf.mxu1 }
 0x230   :  { %v917_v16 = vpack.c.bf16 %v885_v15, %v882_v13  ;;  %4470 = vmatpush3.bf16.msra.mxu0 %v5026_v27  ;;  %v717_v13 = vadd.f32 %v4354_v42, %v5333_v50 }
 0x231   :  { %v4397_v18 = vpop.f32.mrf.mxu1  ;;  %4471 = vmatprep.subr.bf16.mxu0 %v5027_v28 }
 0x232   :  { %4423 = vmatprep.mubr.bf16.mxu0 %v917_v16 }
 0x233   :  { %v898_v19 = vpop.f32.mrf.mxu1  ;;  %4424 = vmatmul.mubr.bf16.gmra.mxu0 %v918_v17 }
 0x234   :  { %4472 = vmatpush3.bf16.msra.mxu0 %v5027_v28  ;;  %v749_v28 = vadd.f32 %v4362_v2, %v5349_v58 }
 0x235   :  { %v4398_v20 = vpop.f32.mrf.mxu1  ;;  %4473 = vmatprep.subr.bf16.mxu0 %v5028_v29 }
 0x236   :  { %v920_v21 = vpack.c.bf16 %v4398_v20, %v4397_v18  ;;  %v730_v18 = vadd.f32 %v4357_v44, %v5337_v52  ;;  %v738_v52 = vadd.f32 %v737_v1, %v5347_v57 }
 0x237   :  { %v901_v22 = vpop.f32.mrf.mxu1 }
 0x238   :  { %v919_v23 = vpack.c.bf16 %v901_v22, %v898_v19  ;;  %4431 = vmatprep.subr.bf16.mxu1 %v920_v21  ;;  %4474 = vmatpush3.bf16.msra.mxu0 %v5028_v29 }
 0x239   :  { %4432 = vmatpush3.bf16.msra.mxu1 %v920_v21  ;;  %4475 = vmatprep.subr.bf16.mxu0 %v5029_v30 }
 0x23a   :  { %4427 = vmatprep.mubr.bf16.mxu0 %v919_v23  ;;  %4433 = vmatprep.subr.bf16.mxu1 %v919_v23 }
 0x23b   :  { %4428 = vmatmul.mubr.bf16.gmra.mxu0 %v920_v21  ;;  %v733_v21 = vadd.f32 %v4358_v46, %v5341_v54 }
 0x23c   :  { %4476 = vmatpush3.bf16.msra.mxu0 %v5029_v30 }
 0x23d   :  { %4434 = vmatpush3.bf16.msra.mxu1 %v919_v23  ;;  %4477 = vmatprep.subr.bf16.mxu0 %v5030_v32 }
 0x23e   :  { %4435 = vmatprep.subr.bf16.mxu1 %v918_v17 }
 0x240   :  { %4478 = vmatpush3.bf16.msra.mxu0 %v5030_v32 }
 0x241   :  { %4436 = vmatpush3.bf16.msra.mxu1 %v918_v17 }
 0x242   :  { %4437 = vmatprep.subr.bf16.mxu1 %v917_v16 }
 0x245   :  { %4438 = vmatpush3.bf16.msra.mxu1 %v917_v16 }
 0x246   :  { %4439 = vmatprep.subr.bf16.mxu1 %v916_v11 }
 0x249   :  { %4440 = vmatpush3.bf16.msra.mxu1 %v916_v11 }
 0x24a   :  { %4441 = vmatprep.subr.bf16.mxu1 %v915_v10 }
 0x24d   :  { %4442 = vmatpush3.bf16.msra.mxu1 %v915_v10  ;;  %v706_v10 = vadd.f32 %v705_v41, %v5331_v49 }
 0x24e   :  { %4443 = vmatprep.subr.bf16.mxu1 %v914_v5 }
 0x251   :  { %4444 = vmatpush3.bf16.msra.mxu1 %v914_v5 }
 0x252   :  { %4445 = vmatprep.subr.bf16.mxu1 %v913_v4 }
 0x255   :  { %4446 = vmatpush3.bf16.msra.mxu1 %v913_v4  ;;  %v4365_v4 = vpop.f32.mrf.mxu0 }
 0x256   :  { %v762_v40 = vadd.f32 %v4365_v4, %v5353_v60 }
 0x257   :  { %v753_v5 = vpop.f32.mrf.mxu0 }
 0x258   :  { %4448 = vmatmul.mubr.bf16.vlgmr.msra.gmra.mxu1 %v5307_v33  ;;  %v754_v56 = vadd.f32 %v753_v5, %v5355_v61 }
 0x259   :  { %4451 = vmatprep.mubr.bf16.mxu1 %v5309_v34  ;;  %v4366_v6 = vpop.f32.mrf.mxu0 }
 0x25a   :  { %v765_v44 = vadd.f32 %v4366_v6, %v5357_v62 }
 0x25b   :  { %v5375_v7 = vpop.f32.mrf.mxu0 }
 0x260   :  { %4452 = vmatmul.mubr.bf16.gmra.mxu1 %v5313_v35 }
 0x261   :  { %4455 = vmatprep.mubr.bf16.mxu1 %v5315_v36 }
 0x268   :  { %4456 = vmatmul.mubr.bf16.gmra.mxu1 %v5319_v37 }
 0x269   :  { %4459 = vmatprep.mubr.bf16.mxu1 %v5321_v38 }
 0x270   :  { %4460 = vmatmul.mubr.bf16.gmra.mxu1 %v5325_v39 }
 0x271   :  { %4511 = vmatprep.mubr.bf16.mxu1 %v5304_v31 }
 0x2e3   :  { %v4417_v9 = vpop.f32.mrf.mxu0 }
 0x2e4   :  { %v5379_v11 = vadd.f32 %v4417_v9, %v714_v8 }
 0x2e5   :  { %v1020_v12 = vpop.f32.mrf.mxu0 }
 0x2e6   :  { %v5382_v14 = vadd.f32 %v1020_v12, %v706_v10 }
 0x2e7   :  { %v4418_v15 = vpop.f32.mrf.mxu0 }
 0x2e8   :  { %v5384_v16 = vadd.f32 %v4418_v15, %v717_v13 }
 0x2e9   :  { %v5386_v17 = vpop.f32.mrf.mxu0 }
 0x2eb   :  { %v4421_v19 = vpop.f32.mrf.mxu0 }
 0x2ec   :  { %v5390_v20 = vadd.f32 %v4421_v19, %v730_v18 }
 0x2ed   :  { %v1036_v49 = vpop.f32.mrf.mxu0 }
 0x2ee   :  { %v5393_v22 = vadd.f32 %v1036_v49, %v722_v48 }
 0x2ef   :  { %v4422_v50 = vpop.f32.mrf.mxu0 }
 0x2f0   :  { %v5395_v23 = vadd.f32 %v4422_v50, %v733_v21 }
 0x2f1   :  { %v5397_v24 = vpop.f32.mrf.mxu0 }
 0x2f3   :  { %v4425_v26 = vpop.f32.mrf.mxu0 }
 0x2f4   :  { %v5401_v27 = vadd.f32 %v4425_v26, %v746_v25 }
 0x2f5   :  { %v1052_v53 = vpop.f32.mrf.mxu0 }
 0x2f6   :  { %v5404_v29 = vadd.f32 %v1052_v53, %v738_v52  ;;  %v5031_v53 = vld [vmem:[#allocation8 + $0x138] sm:$0xff]  }
 0x2f7   :  { %v4426_v54 = vpop.f32.mrf.mxu0  ;;  %4527 = vmatprep.subr.bf16.mxu0 %v5031_v53 }
 0x2f8   :  { %v5406_v30 = vadd.f32 %v4426_v54, %v749_v28  ;;  %v5032_v28 = vld [vmem:[#allocation8 + $0x130] sm:$0xff]   ;;  %v5033_v54 = vld [vmem:[#allocation8 + $0x128] sm:$0xff]  }
 0x2f9   :  { %v5408_v32 = vpop.f32.mrf.mxu0 }
 0x2fb   :  { %v4429_v41 = vpop.f32.mrf.mxu0 }
 0x2fc   :  { %v5412_v42 = vadd.f32 %v4429_v41, %v762_v40  ;;  %v5034_v40 = vld [vmem:[#allocation8 + $0x120] sm:$0xff]   ;;  %v5035_v41 = vld [vmem:[#allocation8 + $0x118] sm:$0xff]  }
 0x2fd   :  { %v1068_v57 = vpop.f32.mrf.mxu0 }
 0x2fe   :  { %v5415_v45 = vadd.f32 %v1068_v57, %v754_v56  ;;  %v5036_v56 = vld [vmem:[#allocation8 + $0x110] sm:$0xff]   ;;  %v5037_v57 = vld [vmem:[#allocation8 + $0x108] sm:$0xff]  }
 0x2ff   :  { %v4430_v58 = vpop.f32.mrf.mxu0 }
 0x300   :  { %v5417_v46 = vadd.f32 %v4430_v58, %v765_v44  ;;  %v5038_v44 = vld [vmem:[#allocation8 + $0x100] sm:$0xff]  }
 0x301   :  { %v5427_v58 = vpop.f32.mrf.mxu0 }
 0x318   :  { %v4449_v0 = vpop.f32.mrf.mxu1 }
 0x31a   :  { %v1133_v1 = vpop.f32.mrf.mxu1 }
 0x31c   :  { %v4450_v2 = vpop.f32.mrf.mxu1 }
 0x31d   :  { %v1197_v10 = vpack.c.bf16 %v4450_v2, %v4449_v0 }
 0x31e   :  { %v1136_v8 = vpop.f32.mrf.mxu1 }
 0x31f   :  { %v1196_v9 = vpack.c.bf16 %v1136_v8, %v1133_v1 }
 0x320   :  { %v4453_v60 = vpop.f32.mrf.mxu1 }
 0x321   :  { %4479 = vmatprep.mubr.bf16.mxu0 %v1196_v9 }
 0x322   :  { %v1149_v4 = vpop.f32.mrf.mxu1  ;;  %4480 = vmatmul.mubr.bf16.vlgmr.msra.gmra.mxu0 %v1197_v10 }
 0x323   :  { %4528 = vmatpush3.bf16.msra.mxu0 %v5031_v53 }
 0x324   :  { %v4454_v61 = vpop.f32.mrf.mxu1  ;;  %4529 = vmatprep.subr.bf16.mxu0 %v5032_v28 }
 0x325   :  { %v1199_v13 = vpack.c.bf16 %v4454_v61, %v4453_v60 }
 0x326   :  { %v1152_v5 = vpop.f32.mrf.mxu1 }
 0x327   :  { %v1198_v12 = vpack.c.bf16 %v1152_v5, %v1149_v4  ;;  %4530 = vmatpush3.bf16.msra.mxu0 %v5032_v28 }
 0x328   :  { %v4457_v62 = vpop.f32.mrf.mxu1  ;;  %4531 = vmatprep.subr.bf16.mxu0 %v5033_v54 }
 0x329   :  { %4483 = vmatprep.mubr.bf16.mxu0 %v1198_v12 }
 0x32a   :  { %v1165_v6 = vpop.f32.mrf.mxu1  ;;  %4484 = vmatmul.mubr.bf16.gmra.mxu0 %v1199_v13 }
 0x32b   :  { %4532 = vmatpush3.bf16.msra.mxu0 %v5033_v54 }
 0x32c   :  { %v4458_v15 = vpop.f32.mrf.mxu1  ;;  %4533 = vmatprep.subr.bf16.mxu0 %v5034_v40 }
 0x32d   :  { %v1201_v48 = vpack.c.bf16 %v4458_v15, %v4457_v62 }
 0x32e   :  { %v1168_v18 = vpop.f32.mrf.mxu1 }
 0x32f   :  { %v1200_v19 = vpack.c.bf16 %v1168_v18, %v1165_v6  ;;  %4534 = vmatpush3.bf16.msra.mxu0 %v5034_v40 }
 0x330   :  { %v4461_v49 = vpop.f32.mrf.mxu1  ;;  %4535 = vmatprep.subr.bf16.mxu0 %v5035_v41 }
 0x331   :  { %4487 = vmatprep.mubr.bf16.mxu0 %v1200_v19 }
 0x332   :  { %v1181_v21 = vpop.f32.mrf.mxu1  ;;  %4488 = vmatmul.mubr.bf16.gmra.mxu0 %v1201_v48 }
 0x333   :  { %4536 = vmatpush3.bf16.msra.mxu0 %v5035_v41 }
 0x334   :  { %v4462_v50 = vpop.f32.mrf.mxu1  ;;  %4537 = vmatprep.subr.bf16.mxu0 %v5036_v56 }
 0x335   :  { %v1203_v25 = vpack.c.bf16 %v4462_v50, %v4461_v49 }
 0x336   :  { %v1184_v26 = vpop.f32.mrf.mxu1 }
 0x337   :  { %v1202_v52 = vpack.c.bf16 %v1184_v26, %v1181_v21  ;;  %4495 = vmatprep.subr.bf16.mxu1 %v1203_v25  ;;  %4538 = vmatpush3.bf16.msra.mxu0 %v5036_v56 }
 0x338   :  { %4496 = vmatpush3.bf16.msra.mxu1 %v1203_v25  ;;  %4539 = vmatprep.subr.bf16.mxu0 %v5037_v57 }
 0x339   :  { %4491 = vmatprep.mubr.bf16.mxu0 %v1202_v52  ;;  %4497 = vmatprep.subr.bf16.mxu1 %v1202_v52 }
 0x33a   :  { %4492 = vmatmul.mubr.bf16.gmra.mxu0 %v1203_v25 }
 0x33b   :  { %4540 = vmatpush3.bf16.msra.mxu0 %v5037_v57 }
 0x33c   :  { %4498 = vmatpush3.bf16.msra.mxu1 %v1202_v52  ;;  %4541 = vmatprep.subr.bf16.mxu0 %v5038_v44 }
 0x33d   :  { %4499 = vmatprep.subr.bf16.mxu1 %v1201_v48 }
 0x33f   :  { %4542 = vmatpush3.bf16.msra.mxu0 %v5038_v44 }
 0x340   :  { %4500 = vmatpush3.bf16.msra.mxu1 %v1201_v48 }
 0x341   :  { %4501 = vmatprep.subr.bf16.mxu1 %v1200_v19 }
 0x344   :  { %4502 = vmatpush3.bf16.msra.mxu1 %v1200_v19 }
 0x345   :  { %4503 = vmatprep.subr.bf16.mxu1 %v1199_v13 }
 0x348   :  { %4504 = vmatpush3.bf16.msra.mxu1 %v1199_v13 }
 0x349   :  { %4505 = vmatprep.subr.bf16.mxu1 %v1198_v12 }
 0x34c   :  { %4506 = vmatpush3.bf16.msra.mxu1 %v1198_v12 }
 0x34d   :  { %4507 = vmatprep.subr.bf16.mxu1 %v1197_v10 }
 0x350   :  { %4508 = vmatpush3.bf16.msra.mxu1 %v1197_v10 }
 0x351   :  { %4509 = vmatprep.subr.bf16.mxu1 %v1196_v9 }
 0x354   :  { %4510 = vmatpush3.bf16.msra.mxu1 %v1196_v9 }
 0x357   :  { %4512 = vmatmul.mubr.bf16.vlgmr.msra.gmra.mxu1 %v5307_v33 }
 0x358   :  { %4515 = vmatprep.mubr.bf16.mxu1 %v5309_v34 }
 0x35f   :  { %4516 = vmatmul.mubr.bf16.gmra.mxu1 %v5313_v35 }
 0x360   :  { %4519 = vmatprep.mubr.bf16.mxu1 %v5315_v36 }
 0x367   :  { %4520 = vmatmul.mubr.bf16.gmra.mxu1 %v5319_v37 }
 0x368   :  { %4523 = vmatprep.mubr.bf16.mxu1 %v5321_v38 }
 0x36f   :  { %4524 = vmatmul.mubr.bf16.gmra.mxu1 %v5325_v39 }
 0x370   :  { %4575 = vmatprep.mubr.bf16.mxu1 %v5304_v31 }
 0x3e2   :  { %v4481_v0 = vpop.f32.mrf.mxu0 }
 0x3e3   :  { %v5430_v1 = vadd.f32 %v4481_v0, %v5379_v11 }
 0x3e4   :  { %v1303_v2 = vpop.f32.mrf.mxu0 }
 0x3e5   :  { %v5433_v8 = vadd.f32 %v1303_v2, %v5382_v14 }
 0x3e6   :  { %v4482_v9 = vpop.f32.mrf.mxu0 }
 0x3e7   :  { %v5436_v10 = vadd.f32 %v4482_v9, %v5384_v16 }
 0x3e8   :  { %v5438_v60 = vpop.f32.mrf.mxu0 }
 0x3ea   :  { %v4485_v4 = vpop.f32.mrf.mxu0 }
 0x3eb   :  { %v5441_v61 = vadd.f32 %v4485_v4, %v5390_v20 }
 0x3ec   :  { %v1319_v5 = vpop.f32.mrf.mxu0 }
 0x3ed   :  { %v5444_v12 = vadd.f32 %v1319_v5, %v5393_v22 }
 0x3ee   :  { %v4486_v11 = vpop.f32.mrf.mxu0 }
 0x3ef   :  { %v5447_v13 = vadd.f32 %v4486_v11, %v5395_v23 }
 0x3f0   :  { %v5449_v14 = vpop.f32.mrf.mxu0 }
 0x3f2   :  { %v4489_v62 = vpop.f32.mrf.mxu0 }
 0x3f3   :  { %v5452_v16 = vadd.f32 %v4489_v62, %v5401_v27  ;;  %v5039_v62 = vld [vmem:[#allocation8 + $0x178] sm:$0xff]  }
 0x3f4   :  { %v1335_v6 = vpop.f32.mrf.mxu0  ;;  %4591 = vmatprep.subr.bf16.mxu0 %v5039_v62 }
 0x3f5   :  { %v5455_v15 = vadd.f32 %v1335_v6, %v5404_v29  ;;  %v5040_v6 = vld [vmem:[#allocation8 + $0x170] sm:$0xff]  }
 0x3f6   :  { %v4490_v20 = vpop.f32.mrf.mxu0 }
 0x3f7   :  { %v5458_v18 = vadd.f32 %v4490_v20, %v5406_v30 }
 0x3f8   :  { %v5460_v22 = vpop.f32.mrf.mxu0 }
 0x3fa   :  { %v4493_v19 = vpop.f32.mrf.mxu0 }
 0x3fb   :  { %v5463_v23 = vadd.f32 %v4493_v19, %v5412_v42 }
 0x3fc   :  { %v1351_v48 = vpop.f32.mrf.mxu0 }
 0x3fd   :  { %v5466_v49 = vadd.f32 %v1351_v48, %v5415_v45 }
 0x417   :  { %v4513_v27 = vpop.f32.mrf.mxu1 }
 0x419   :  { %v1416_v21 = vpop.f32.mrf.mxu1 }
 0x41b   :  { %v4514_v50 = vpop.f32.mrf.mxu1 }
 0x41c   :  { %v1480_v26 = vpack.c.bf16 %v4514_v50, %v4513_v27 }
 0x41d   :  { %v1419_v25 = vpop.f32.mrf.mxu1 }
 0x41e   :  { %v1479_v29 = vpack.c.bf16 %v1419_v25, %v1416_v21 }
 0x41f   :  { %v4517_v52 = vpop.f32.mrf.mxu1 }
 0x420   :  { %4543 = vmatprep.mubr.bf16.mxu0 %v1479_v29 }
 0x421   :  { %v1432_v30 = vpop.f32.mrf.mxu1  ;;  %4544 = vmatmul.mubr.bf16.vlgmr.msra.gmra.mxu0 %v1480_v26 }
 0x422   :  { %4592 = vmatpush3.bf16.msra.mxu0 %v5039_v62 }
 0x423   :  { %v4518_v53 = vpop.f32.mrf.mxu1  ;;  %4593 = vmatprep.subr.bf16.mxu0 %v5040_v6 }
 0x424   :  { %v1482_v40 = vpack.c.bf16 %v4518_v53, %v4517_v52 }
 0x425   :  { %v1435_v28 = vpop.f32.mrf.mxu1 }
 0x426   :  { %v1481_v54 = vpack.c.bf16 %v1435_v28, %v1432_v30  ;;  %4594 = vmatpush3.bf16.msra.mxu0 %v5040_v6 }
 0x427   :  { %v4521_v42 = vpop.f32.mrf.mxu1 }
 0x428   :  { %4547 = vmatprep.mubr.bf16.mxu0 %v1481_v54 }
 0x429   :  { %v1448_v41 = vpop.f32.mrf.mxu1  ;;  %4548 = vmatmul.mubr.bf16.gmra.mxu0 %v1482_v40 }
 0x42b   :  { %v4522_v45 = vpop.f32.mrf.mxu1 }
 0x42c   :  { %v1484_v44 = vpack.c.bf16 %v4522_v45, %v4521_v42 }
 0x42d   :  { %v1451_v56 = vpop.f32.mrf.mxu1 }
 0x42e   :  { %v1483_v57 = vpack.c.bf16 %v1451_v56, %v1448_v41 }
 0x42f   :  { %v4525_v0 = vpop.f32.mrf.mxu1 }
 0x430   :  { %4551 = vmatprep.mubr.bf16.mxu0 %v1483_v57 }
 0x431   :  { %v1464_v2 = vpop.f32.mrf.mxu1  ;;  %4552 = vmatmul.mubr.bf16.gmra.mxu0 %v1484_v44 }
 0x433   :  { %v4526_v9 = vpop.f32.mrf.mxu1 }
 0x434   :  { %v1486_v4 = vpack.c.bf16 %v4526_v9, %v4525_v0 }
 0x435   :  { %v1467_v5 = vpop.f32.mrf.mxu1 }
 0x436   :  { %v1485_v11 = vpack.c.bf16 %v1467_v5, %v1464_v2  ;;  %4559 = vmatprep.subr.bf16.mxu1 %v1486_v4 }
 0x437   :  { %4560 = vmatpush3.bf16.msra.mxu1 %v1486_v4 }
 0x438   :  { %4555 = vmatprep.mubr.bf16.mxu0 %v1485_v11  ;;  %4561 = vmatprep.subr.bf16.mxu1 %v1485_v11 }
 0x439   :  { %4556 = vmatmul.mubr.bf16.gmra.mxu0 %v1486_v4 }
 0x43b   :  { %4562 = vmatpush3.bf16.msra.mxu1 %v1485_v11 }
 0x43c   :  { %4563 = vmatprep.subr.bf16.mxu1 %v1484_v44 }
 0x43f   :  { %4564 = vmatpush3.bf16.msra.mxu1 %v1484_v44 }
 0x440   :  { %4565 = vmatprep.subr.bf16.mxu1 %v1483_v57 }
 0x443   :  { %4566 = vmatpush3.bf16.msra.mxu1 %v1483_v57 }
 0x444   :  { %4567 = vmatprep.subr.bf16.mxu1 %v1482_v40 }
 0x447   :  { %4568 = vmatpush3.bf16.msra.mxu1 %v1482_v40 }
 0x448   :  { %4569 = vmatprep.subr.bf16.mxu1 %v1481_v54 }
 0x44b   :  { %4570 = vmatpush3.bf16.msra.mxu1 %v1481_v54 }
 0x44c   :  { %4571 = vmatprep.subr.bf16.mxu1 %v1480_v26 }
 0x44f   :  { %4572 = vmatpush3.bf16.msra.mxu1 %v1480_v26 }
 0x450   :  { %4573 = vmatprep.subr.bf16.mxu1 %v1479_v29 }
 0x453   :  { %4574 = vmatpush3.bf16.msra.mxu1 %v1479_v29 }
 0x456   :  { %4576 = vmatmul.mubr.bf16.vlgmr.msra.gmra.mxu1 %v5307_v33  ;;  %v5041_v33 = vld [vmem:[#allocation8 + $0x168] sm:$0xff]  }
 0x457   :  { %4579 = vmatprep.mubr.bf16.mxu1 %v5309_v34  ;;  %4595 = vmatprep.subr.bf16.mxu0 %v5041_v33  ;;  %v5042_v34 = vld [vmem:[#allocation8 + $0x160] sm:$0xff]  }
 0x458   :  { %4596 = vmatpush3.bf16.msra.mxu0 %v5041_v33 }
 0x459   :  { %4597 = vmatprep.subr.bf16.mxu0 %v5042_v34 }
 0x45c   :  { %4598 = vmatpush3.bf16.msra.mxu0 %v5042_v34 }
 0x45e   :  { %4580 = vmatmul.mubr.bf16.gmra.mxu1 %v5313_v35  ;;  %v5043_v35 = vld [vmem:[#allocation8 + $0x158] sm:$0xff]  }
 0x45f   :  { %4583 = vmatprep.mubr.bf16.mxu1 %v5315_v36  ;;  %4599 = vmatprep.subr.bf16.mxu0 %v5043_v35  ;;  %v5044_v36 = vld [vmem:[#allocation8 + $0x150] sm:$0xff]  }
 0x460   :  { %4600 = vmatpush3.bf16.msra.mxu0 %v5043_v35 }
 0x461   :  { %4601 = vmatprep.subr.bf16.mxu0 %v5044_v36 }
 0x464   :  { %4602 = vmatpush3.bf16.msra.mxu0 %v5044_v36 }
 0x466   :  { %4584 = vmatmul.mubr.bf16.gmra.mxu1 %v5319_v37  ;;  %v5045_v37 = vld [vmem:[#allocation8 + $0x148] sm:$0xff]  }
 0x467   :  { %4587 = vmatprep.mubr.bf16.mxu1 %v5321_v38  ;;  %4603 = vmatprep.subr.bf16.mxu0 %v5045_v37  ;;  %v5476_v38 = vpop.f32.mrf.mxu0 }
 0x468   :  { %4604 = vmatpush3.bf16.msra.mxu0 %v5045_v37 }
 0x46e   :  { %4588 = vmatmul.mubr.bf16.gmra.mxu1 %v5325_v39  ;;  %v5478_v39 = vpop.f32.mrf.mxu0 }
 0x46f   :  { %4639 = vmatprep.mubr.bf16.mxu1 %v5304_v31  ;;  %v5046_v31 = vld [vmem:[#allocation8 + $0x140] sm:$0xff]  }
 0x470   :  { %4605 = vmatprep.subr.bf16.mxu0 %v5046_v31 }
 0x471   :  { %4606 = vmatpush3.bf16.msra.mxu0 %v5046_v31 }
 0x4e1   :  { %v4545_v20 = vpop.f32.mrf.mxu0 }
 0x4e2   :  { %v1651_v19 = vadd.f32 %v4545_v20, %v5430_v1 }
 0x4e3   :  { %v1586_v48 = vpop.f32.mrf.mxu0 }
 0x4e4   :  { %v5482_v27 = vadd.f32 %v1586_v48, %v5433_v8 }
 0x4e5   :  { %v4546_v21 = vpop.f32.mrf.mxu0 }
 0x4e6   :  { %v5485_v50 = vadd.f32 %v4546_v21, %v5436_v10 }
 0x4e7   :  { %v5487_v25 = vpop.f32.mrf.mxu0 }
 0x4e9   :  { %v4549_v29 = vpop.f32.mrf.mxu0 }
 0x4ea   :  { %v5490_v26 = vadd.f32 %v4549_v29, %v5441_v61 }
 0x4eb   :  { %v1602_v52 = vpop.f32.mrf.mxu0 }
 0x4ec   :  { %v5493_v30 = vadd.f32 %v1602_v52, %v5444_v12 }
 0x4ed   :  { %v4550_v34 = vpop.f32.mrf.mxu0 }
 0x4ef   :  { %v5495_v35 = vpop.f32.mrf.mxu0 }
 0x4f1   :  { %v4553_v36 = vpop.f32.mrf.mxu0 }
 0x4f3   :  { %v5497_v37 = vpop.f32.mrf.mxu0 }
 0x4f5   :  { %v5499_v31 = vpop.f32.mrf.mxu0 }
 0x4f7   :  { %v5501_v20 = vpop.f32.mrf.mxu0 }
 0x4f9   :  { %v5503_v48 = vpop.f32.mrf.mxu0 }
 0x4fb   :  { %v5505_v21 = vpop.f32.mrf.mxu0 }
 0x4fd   :  { %v5507_v29 = vpop.f32.mrf.mxu0 }
 0x4ff   :  { %v5509_v52 = vpop.f32.mrf.mxu0 }
 0x516   :  { %v4577_v53 = vpop.f32.mrf.mxu1 }
 0x518   :  { %v1699_v1 = vpop.f32.mrf.mxu1 }
 0x51a   :  { %v4578_v28 = vpop.f32.mrf.mxu1 }
 0x51b   :  { %v1763_v40 = vpack.c.bf16 %v4578_v28, %v4577_v53  ;;  %v5055_v53 = vld [vmem:[#allocation8 + $0x1f8] sm:$0xff]   ;;  %v709_v28 = vadd.f32 %v5369_v43, %v5335_v51 }
 0x51c   :  { %v1702_v54 = vpop.f32.mrf.mxu1  ;;  %4655 = vmatprep.subr.bf16.mxu0 %v5055_v53 }
 0x51d   :  { %v1762_v8 = vpack.c.bf16 %v1702_v54, %v1699_v1  ;;  %v5056_v1 = vld [vmem:[#allocation8 + $0x1f0] sm:$0xff]  }
 0x51e   :  { %v4581_v42 = vpop.f32.mrf.mxu1 }
 0x51f   :  { %4607 = vmatprep.mubr.bf16.mxu0 %v1762_v8  ;;  %v1084_v8 = vadd.f32 %v5386_v17, %v709_v28 }
 0x520   :  { %v1715_v10 = vpop.f32.mrf.mxu1  ;;  %4608 = vmatmul.mubr.bf16.vlgmr.msra.gmra.mxu0 %v1763_v40 }
 0x521   :  { %4656 = vmatpush3.bf16.msra.mxu0 %v5055_v53 }
 0x522   :  { %v4582_v41 = vpop.f32.mrf.mxu1  ;;  %4657 = vmatprep.subr.bf16.mxu0 %v5056_v1 }
 0x523   :  { %v1765_v57 = vpack.c.bf16 %v4582_v41, %v4581_v42  ;;  %v5517_v42 = vld [vmem:[%s5840_s3] ss:$0 sm:$0xff]  ;;  %v5057_v41 = vld [vmem:[#allocation8 + $0x1e8] sm:$0xff]  }
 0x524   :  { %v1718_v45 = vpop.f32.mrf.mxu1 }
 0x525   :  { %v1764_v56 = vpack.c.bf16 %v1718_v45, %v1715_v10  ;;  %v1367_v45 = vadd.f32 %v5438_v60, %v1084_v8  ;;  %4658 = vmatpush3.bf16.msra.mxu0 %v5056_v1 }
 0x526   :  { %v4585_v61 = vpop.f32.mrf.mxu1  ;;  %4659 = vmatprep.subr.bf16.mxu0 %v5057_v41 }
 0x527   :  { %4611 = vmatprep.mubr.bf16.mxu0 %v1764_v56 }
 0x528   :  { %v1731_v44 = vpop.f32.mrf.mxu1  ;;  %4612 = vmatmul.mubr.bf16.gmra.mxu0 %v1765_v57  ;;  %v1650_v57 = vadd.f32 %v5487_v25, %v1367_v45  ;;  %v5059_v25 = vld [vmem:[#allocation8 + $0x1d8] sm:$0xff]  }
 0x529   :  { %4660 = vmatpush3.bf16.msra.mxu0 %v5057_v41 }
 0x52a   :  { %v4586_v12 = vpop.f32.mrf.mxu1 }
 0x52b   :  { %v1767_v9 = vpack.c.bf16 %v4586_v12, %v4585_v61  ;;  %v5058_v61 = vld [vmem:[#allocation8 + $0x1e0] sm:$0xff]  }
 0x52c   :  { %v1734_v0 = vpop.f32.mrf.mxu1  ;;  %4661 = vmatprep.subr.bf16.mxu0 %v5058_v61 }
 0x52d   :  { %v1766_v2 = vpack.c.bf16 %v1734_v0, %v1731_v44  ;;  %4662 = vmatpush3.bf16.msra.mxu0 %v5058_v61 }
 0x52e   :  { %v4589_v4 = vpop.f32.mrf.mxu1  ;;  %4663 = vmatprep.subr.bf16.mxu0 %v5059_v25 }
 0x52f   :  { %4615 = vmatprep.mubr.bf16.mxu0 %v1766_v2 }
 0x530   :  { %v1747_v5 = vpop.f32.mrf.mxu1  ;;  %4616 = vmatmul.mubr.bf16.gmra.mxu0 %v1767_v9 }
 0x531   :  { %4664 = vmatpush3.bf16.msra.mxu0 %v5059_v25 }
 0x532   :  { %v4590_v11 = vpop.f32.mrf.mxu1 }
 0x533   :  { %v1769_v33 = vpack.c.bf16 %v4590_v11, %v4589_v4 }
 0x534   :  { %v1750_v62 = vpop.f32.mrf.mxu1 }
 0x535   :  { %v1768_v6 = vpack.c.bf16 %v1750_v62, %v1747_v5  ;;  %v1656_v5 = vadd.f32 %v4550_v34, %v5447_v13  ;;  %v1659_v13 = vadd.f32 %v4553_v36, %v5452_v16 }
 0x537   :  { %4619 = vmatprep.mubr.bf16.mxu0 %v1768_v6 }
 0x538   :  { %4620 = vmatmul.mubr.bf16.gmra.mxu0 %v1769_v33 }
 0x5e0   :  { %v4609_v54 = vpop.f32.mrf.mxu0 }
 0x5e1   :  { %v1934_v40 = vadd.f32 %v4609_v54, %v1651_v19 }
 0x5e2   :  { %v1869_v10 = vpop.f32.mrf.mxu0 }
 0x5e3   :  { %v1932_v56 = vadd.f32 %v1869_v10, %v5482_v27  ;;  %v1957_v51 = vadd.f32 %v5517_v42, %v1934_v40  ;;  %v5060_v40 = vld [vmem:[#allocation8 + $0x1d0] sm:$0xff]  }
 0x5e4   :  { %v4610_v43 = vpop.f32.mrf.mxu0  ;;  %4665 = vmatprep.subr.bf16.mxu0 %v5060_v40 }
 0x5e5   :  { %v1935_v17 = vadd.f32 %v4610_v43, %v5485_v50  ;;  %v1955_v44 = vadd.f32 %v5517_v42, %v1932_v56  ;;  %v1989_v2 = vmul.f32 0.01, %v1957_v51  ;;  %vm1973_vm1 = vcmp.ge.f32.partialorder %v1957_v51, 0.0  ;;  %4666 = vmatpush3.bf16.msra.mxu0 %v5060_v40 }
 0x5e6   :  { %v1872_v19 = vpop.f32.mrf.mxu0 }
 0x5e7   :  { %v1958_v12 = vadd.f32 %v5517_v42, %v1935_v17  ;;  %v1933_v0 = vadd.f32 %v1872_v19, %v1650_v57  ;;  %v1987_v11 = vmul.f32 0.01, %v1955_v44  ;;  %vm1971_vm3 = vcmp.ge.f32.partialorder %v1955_v44, 0.0 }
 0x5e8   :  { %v4613_v60 = vpop.f32.mrf.mxu0  ;;  %v2005_v28 = vsel %vm1973_vm1, %v1957_v51, %v1989_v2  ;;  %v1660_v17 = vadd.f32 %v5499_v31, %v5458_v18 }
 0x5e9   :  { %vm1974_vm0 = vcmp.ge.f32.partialorder %v1958_v12, 0.0  ;;  %v1990_v27 = vmul.f32 0.01, %v1958_v12  ;;  %v1956_v9 = vadd.f32 %v5517_v42, %v1933_v0  ;;  %v1938_v4 = vadd.f32 %v4613_v60, %v5490_v26 }
 0x5ea   :  { %v5528_v50 = vpop.f32.mrf.mxu0  ;;  %v2003_v10 = vsel %vm1971_vm3, %v1955_v44, %v1987_v11  ;;  %v757_v0 = vadd.f32 %v5375_v7, %v5359_v63 }
 0x5eb   :  { %vm1972_vm2 = vcmp.ge.f32.partialorder %v1956_v9, 0.0  ;;  %v1988_v62 = vmul.f32 0.01, %v1956_v9  ;;  %v2006_v33 = vsel %vm1974_vm0, %v1958_v12, %v1990_v27  ;;  %v1961_v53 = vadd.f32 %v5517_v42, %v1938_v4 }
 0x5ec   :  { %v4614_v6 = vpop.f32.mrf.mxu0  ;;  %v5534_v54 = vpack.c.bf16 %v2006_v33, %v2005_v28  ;;  %v741_v12 = vadd.f32 %v5373_v3, %v5351_v59  ;;  %v1663_v27 = vadd.f32 %v5503_v48, %v5463_v23  ;;  %v1381_v4 = vadd.f32 %v5476_v38, %v5417_v46 }
 0x5ed   :  { %v1939_v1 = vadd.f32 %v4614_v6, %v1656_v5  ;;  %v2004_v8 = vsel %vm1972_vm2, %v1956_v9, %v1988_v62  ;;  %v1993_v56 = vmul.f32 0.01, %v1961_v53  ;;  %vm1977_vm5 = vcmp.ge.f32.partialorder %v1961_v53, 0.0 }
 0x5ee   :  { %v5532_v26 = vpop.f32.mrf.mxu0  ;;  %v5538_v45 = vpack.c.bf16 %v2004_v8, %v2003_v10  ;;  %v1092_v31 = vadd.f32 %v5408_v32, %v741_v12  ;;  %v1096_v9 = vadd.f32 %v5427_v58, %v757_v0  ;;  %v1661_v59 = vadd.f32 %v5505_v21, %v5466_v49 }
 0x5ef   :  { %v1962_v34 = vadd.f32 %v5517_v42, %v1939_v1  ;;  %v2009_v44 = vsel %vm1977_vm5, %v1961_v53, %v1993_v56  ;;  %v1664_v32 = vadd.f32 %v5507_v29, %v1381_v4  ;;  %v5049_v4 = vld [vmem:[#allocation8 + $0x1a8] sm:$0xff]  }
 0x5f0   :  { %v4617_v41 = vpop.f32.mrf.mxu0  ;;  %v1375_v5 = vadd.f32 %v5460_v22, %v1092_v31  ;;  %v1379_v48 = vadd.f32 %v5478_v39, %v1096_v9  ;;  %v725_v22 = vadd.f32 %v5371_v47, %v5343_v55  ;;  %v1657_v39 = vadd.f32 %v5497_v37, %v5455_v15  ;;  %v5599_v31 = vld [vmem:[#allocation2 + $0x8] sm:$0xff]   ;;  %v5602_v9 = vld [vmem:[#allocation2 + $0x10] sm:$0xff]  }
 0x5f1   :  { %vm1978_vm4 = vcmp.ge.f32.partialorder %v1962_v34, 0.0  ;;  %v1994_v43 = vmul.f32 0.01, %v1962_v34  ;;  %v1942_v51 = vadd.f32 %v4617_v41, %v1659_v13 }
 0x5f2   :  { %v1901_v57 = vpop.f32.mrf.mxu0  ;;  %v1658_v46 = vadd.f32 %v5501_v20, %v1375_v5  ;;  %v1662_v21 = vadd.f32 %v5509_v52, %v1379_v48  ;;  %v1088_v52 = vadd.f32 %v5397_v24, %v725_v22  ;;  %v5611_v5 = vld [vmem:[#allocation2 + $0x28] sm:$0xff]  }
 0x5f3   :  { %v2010_v61 = vsel %vm1978_vm4, %v1962_v34, %v1994_v43  ;;  %v1965_v16 = vadd.f32 %v5517_v42, %v1942_v51  ;;  %v1940_v40 = vadd.f32 %v1901_v57, %v1657_v39  ;;  %v5053_v48 = vld [vmem:[#allocation8 + $0x188] sm:$0xff]  }
 0x5f4   :  { %v4618_v19 = vpop.f32.mrf.mxu0  ;;  %v5547_v60 = vpack.c.bf16 %v2010_v61, %v2009_v44  ;;  %v1371_v47 = vadd.f32 %v5449_v14, %v1088_v52  ;;  %v1936_v61 = vadd.f32 %v5528_v50, %v5493_v30 }
 0x5f5   :  { %v1943_v36 = vadd.f32 %v4618_v19, %v1660_v17  ;;  %v1997_v63 = vmul.f32 0.01, %v1965_v16  ;;  %vm1981_vm7 = vcmp.ge.f32.partialorder %v1965_v16, 0.0  ;;  %v1963_v43 = vadd.f32 %v5517_v42, %v1940_v40 }
 0x5f6   :  { %v1904_v2 = vpop.f32.mrf.mxu0  ;;  %v1654_v24 = vadd.f32 %v5495_v35, %v1371_v47 }
 0x5f7   :  { %v1966_v18 = vadd.f32 %v5517_v42, %v1943_v36  ;;  %v2013_v33 = vsel %vm1981_vm7, %v1965_v16, %v1997_v63  ;;  %v1941_v29 = vadd.f32 %v1904_v2, %v1658_v46  ;;  %v1995_v35 = vmul.f32 0.01, %v1963_v43  ;;  %v5608_v63 = vld [vmem:[#allocation2 + $0x20] sm:$0xff]  }
 0x5f8   :  { %v4621_v3 = vpop.f32.mrf.mxu0  ;;  %v1937_v14 = vadd.f32 %v5532_v26, %v1654_v24  ;;  %vm1979_vm13 = vcmp.ge.f32.partialorder %v1963_v43, 0.0  ;;  %v1959_v26 = vadd.f32 %v5517_v42, %v1936_v61  ;;  %v5062_v46 = vld [vmem:[#allocation8 + $0x1c0] sm:$0xff]  }
 0x5f9   :  { %vm1982_vm6 = vcmp.ge.f32.partialorder %v1966_v18, 0.0  ;;  %v1998_v7 = vmul.f32 0.01, %v1966_v18  ;;  %v1946_v25 = vadd.f32 %v4621_v3, %v1663_v27  ;;  %v1964_v15 = vadd.f32 %v5517_v42, %v1941_v29  ;;  %v5605_v3 = vld [vmem:[#allocation2 + $0x18] sm:$0xff]   ;;  %v5066_v24 = vld [vmem:[#allocation8 + $0x220] sm:$0xff]  }
 0x5fa   :  { %v1917_v23 = vpop.f32.mrf.mxu0  ;;  %v1960_v16 = vadd.f32 %v5517_v42, %v1937_v14  ;;  %v2011_v44 = vsel %vm1979_vm13, %v1963_v43, %v1995_v35  ;;  %v1991_v2 = vmul.f32 0.01, %v1959_v26  ;;  %vm1975_vm15 = vcmp.ge.f32.partialorder %v1959_v26, 0.0  ;;  %v5067_v43 = vld [vmem:[#allocation8 + $0x218] sm:$0xff]  }
 0x5fb   :  { %v1969_v58 = vadd.f32 %v5517_v42, %v1946_v25  ;;  %v1944_v11 = vadd.f32 %v1917_v23, %v1661_v59  ;;  %v2014_v49 = vsel %vm1982_vm6, %v1966_v18, %v1998_v7  ;;  %v1996_v19 = vmul.f32 0.01, %v1964_v15  ;;  %v5048_v18 = vld [vmem:[#allocation8 + $0x1b0] sm:$0xff]   ;;  %v5050_v59 = vld [vmem:[#allocation8 + $0x1a0] sm:$0xff]   ;;  %v5051_v7 = vld [vmem:[#allocation8 + $0x198] sm:$0xff]  }
 0x5fc   :  { %v4622_v38 = vpop.f32.mrf.mxu0  ;;  %v5569_v1 = vpack.c.bf16 %v2014_v49, %v2013_v33  ;;  %vm1980_vm12 = vcmp.ge.f32.partialorder %v1964_v15, 0.0  ;;  %v1992_v0 = vmul.f32 0.01, %v1960_v16  ;;  %vm1976_vm14 = vcmp.ge.f32.partialorder %v1960_v16, 0.0  ;;  %v5052_v25 = vld [vmem:[#allocation8 + $0x190] sm:$0xff]  }
 0x5fd   :  { %v1967_v62 = vadd.f32 %v5517_v42, %v1944_v11  ;;  %v1947_v6 = vadd.f32 %v4622_v38, %v1664_v32  ;;  %v2001_v28 = vmul.f32 0.01, %v1969_v58  ;;  %vm1985_vm8 = vcmp.ge.f32.partialorder %v1969_v58, 0.0  ;;  %v5614_v23 = vld [vmem:[#allocation2 + $0x30] sm:$0xff]   ;;  %v5054_v32 = vld [vmem:[#allocation8 + $0x180] sm:$0xff]   ;;  %v5061_v11 = vld [vmem:[#allocation8 + $0x1c8] sm:$0xff]  }
 0x5fe   :  { %v1920_v53 = vpop.f32.mrf.mxu0  ;;  %v2012_v36 = vsel %vm1980_vm12, %v1964_v15, %v1996_v19  ;;  %v2008_v30 = vsel %vm1976_vm14, %v1960_v16, %v1992_v0  ;;  %v2007_v50 = vsel %vm1975_vm15, %v1959_v26, %v1991_v2  ;;  %4667 = vmatprep.subr.bf16.mxu0 %v5061_v11 }
 0x5ff   :  { %v1970_v20 = vadd.f32 %v5517_v42, %v1947_v6  ;;  %v1945_v8 = vadd.f32 %v1920_v53, %v1662_v21  ;;  %v1999_v13 = vmul.f32 0.01, %v1967_v62  ;;  %vm1983_vm10 = vcmp.ge.f32.partialorder %v1967_v62, 0.0  ;;  %4668 = vmatpush3.bf16.msra.mxu0 %v5061_v11 }
 0x600   :  { %v2017_v10 = vsel %vm1985_vm8, %v1969_v58, %v2001_v28  ;;  %v2023_v12 = vpack.c.bf16 %v2012_v36, %v2011_v44  ;;  %v2021_v27 = vpack.c.bf16 %v2008_v30, %v2007_v50  ;;  %v5617_v58 = vld [vmem:[#allocation2 + $0x38] sm:$0xff]   ;;  %4669 = vmatprep.subr.bf16.mxu0 %v5062_v46 }
 0x601   :  { %vm1986_vm9 = vcmp.ge.f32.partialorder %v1970_v20, 0.0  ;;  %v2002_v34 = vmul.f32 0.01, %v1970_v20  ;;  %v1968_v55 = vadd.f32 %v5517_v42, %v1945_v8  ;;  %v2015_v51 = vsel %vm1983_vm10, %v1967_v62, %v1999_v13  ;;  %v5047_v42 = vld [vmem:[#allocation8 + $0x1b8] sm:$0xff]  }
 0x603   :  { %vm1984_vm11 = vcmp.ge.f32.partialorder %v1968_v55, 0.0  ;;  %v2000_v37 = vmul.f32 0.01, %v1968_v55  ;;  %v2018_v41 = vsel %vm1986_vm9, %v1970_v20, %v2002_v34  ;;  %4670 = vmatpush3.bf16.msra.mxu0 %v5062_v46 }
 0x604   :  { %v5576_v56 = vpack.c.bf16 %v2018_v41, %v2017_v10  ;;  %v5063_v10 = vld [vmem:[#allocation8 + $0x238] sm:$0xff]   ;;  %v5064_v41 = vld [vmem:[#allocation8 + $0x230] sm:$0xff]  }
 0x605   :  { %v2016_v57 = vsel %vm1984_vm11, %v1968_v55, %v2000_v37  ;;  %v5626_v37 = vld [vmem:[#allocation2] sm:$0xff]  }
 0x606   :  { %4623 = vmatprep.subr.bf16.mxu1 %v5576_v56  ;;  %v5581_v17 = vpack.c.bf16 %v2016_v57, %v2015_v51  ;;  %v5068_v51 = vld [vmem:[#allocation8 + $0x210] sm:$0xff]   ;;  %v5069_v57 = vld [vmem:[#allocation8 + $0x208] sm:$0xff]  }
 0x607   :  { %4624 = vmatpush3.bf16.msra.mxu1 %v5576_v56 }
 0x608   :  { %4625 = vmatprep.subr.bf16.mxu1 %v5581_v17 }
 0x60b   :  { %4626 = vmatpush3.bf16.msra.mxu1 %v5581_v17 }
 0x60c   :  { %4627 = vmatprep.subr.bf16.mxu1 %v5569_v1 }
 0x60f   :  { %4628 = vmatpush3.bf16.msra.mxu1 %v5569_v1 }
 0x610   :  { %4629 = vmatprep.subr.bf16.mxu1 %v2023_v12 }
 0x613   :  { %4630 = vmatpush3.bf16.msra.mxu1 %v2023_v12 }
 0x614   :  { %4631 = vmatprep.subr.bf16.mxu1 %v5547_v60 }
 0x617   :  { %4632 = vmatpush3.bf16.msra.mxu1 %v5547_v60 }
 0x618   :  { %4633 = vmatprep.subr.bf16.mxu1 %v2021_v27 }
 0x61b   :  { %4634 = vmatpush3.bf16.msra.mxu1 %v2021_v27 }
 0x61c   :  { %4635 = vmatprep.subr.bf16.mxu1 %v5534_v54 }
 0x61f   :  { %4636 = vmatpush3.bf16.msra.mxu1 %v5534_v54 }
 0x620   :  { %4637 = vmatprep.subr.bf16.mxu1 %v5538_v45 }
 0x623   :  { %4638 = vmatpush3.bf16.msra.mxu1 %v5538_v45 }
 0x624   :  { %4687 = vmatprep.subr.bf16.mxu1 %v5047_v42 }
 0x626   :  { %4640 = vmatmul.mubr.bf16.vlgmr.msra.gmra.mxu1 %v5599_v31 }
 0x627   :  { %4688 = vmatpush3.bf16.msra.mxu1 %v5047_v42  ;;  %4643 = vmatprep.mubr.bf16.mxu1 %v5602_v9 }
 0x628   :  { %4689 = vmatprep.subr.bf16.mxu1 %v5048_v18 }
 0x62b   :  { %4690 = vmatpush3.bf16.msra.mxu1 %v5048_v18 }
 0x62c   :  { %4691 = vmatprep.subr.bf16.mxu1 %v5049_v4 }
 0x62e   :  { %4644 = vmatmul.mubr.bf16.gmra.mxu1 %v5605_v3 }
 0x62f   :  { %4692 = vmatpush3.bf16.msra.mxu1 %v5049_v4  ;;  %4647 = vmatprep.mubr.bf16.mxu1 %v5608_v63 }
 0x630   :  { %4693 = vmatprep.subr.bf16.mxu1 %v5050_v59 }
 0x633   :  { %4694 = vmatpush3.bf16.msra.mxu1 %v5050_v59 }
 0x634   :  { %4695 = vmatprep.subr.bf16.mxu1 %v5051_v7 }
 0x636   :  { %4648 = vmatmul.mubr.bf16.gmra.mxu1 %v5611_v5 }
 0x637   :  { %4696 = vmatpush3.bf16.msra.mxu1 %v5051_v7  ;;  %4651 = vmatprep.mubr.bf16.mxu1 %v5614_v23 }
 0x638   :  { %4697 = vmatprep.subr.bf16.mxu1 %v5052_v25 }
 0x63b   :  { %4698 = vmatpush3.bf16.msra.mxu1 %v5052_v25 }
 0x63c   :  { %4699 = vmatprep.subr.bf16.mxu1 %v5053_v48 }
 0x63e   :  { %4652 = vmatmul.mubr.bf16.gmra.mxu1 %v5617_v58 }
 0x63f   :  { %4700 = vmatpush3.bf16.msra.mxu1 %v5053_v48  ;;  %4703 = vmatprep.mubr.bf16.mxu1 %v5538_v45 }
 0x640   :  { %4701 = vmatprep.subr.bf16.mxu1 %v5054_v32 }
 0x643   :  { %4702 = vmatpush3.bf16.msra.mxu1 %v5054_v32 }
 0x644   :  { %4751 = vmatprep.subr.bf16.mxu1 %v5063_v10 }
 0x646   :  { %4704 = vmatmul.mubr.bf16.vlgmr.msra.gmra.mxu1 %v5534_v54 }
 0x647   :  { %4707 = vmatprep.mubr.bf16.mxu1 %v2021_v27  ;;  %4752 = vmatpush3.bf16.msra.mxu1 %v5063_v10 }
 0x648   :  { %4753 = vmatprep.subr.bf16.mxu1 %v5064_v41 }
 0x64b   :  { %4754 = vmatpush3.bf16.msra.mxu1 %v5064_v41 }
 0x64e   :  { %4708 = vmatmul.mubr.bf16.gmra.mxu1 %v5547_v60 }
 0x64f   :  { %4711 = vmatprep.mubr.bf16.mxu1 %v2023_v12 }
 0x656   :  { %4712 = vmatmul.mubr.bf16.gmra.mxu1 %v5569_v1 }
 0x657   :  { %4715 = vmatprep.mubr.bf16.mxu1 %v5581_v17  ;;  %v5070_v17 = vld [vmem:[#allocation8 + $0x200] sm:$0xff]  }
 0x65e   :  { %4716 = vmatmul.mubr.bf16.gmra.mxu1 %v5576_v56  ;;  %v5065_v56 = vld [vmem:[#allocation8 + $0x228] sm:$0xff]  }
 0x65f   :  { %4755 = vmatprep.subr.bf16.mxu1 %v5065_v56 }
 0x660   :  { %4756 = vmatpush3.bf16.msra.mxu1 %v5065_v56 }
 0x661   :  { %4757 = vmatprep.subr.bf16.mxu1 %v5066_v24 }
 0x664   :  { %4758 = vmatpush3.bf16.msra.mxu1 %v5066_v24 }
 0x665   :  { %4759 = vmatprep.subr.bf16.mxu1 %v5067_v43 }
 0x668   :  { %4760 = vmatpush3.bf16.msra.mxu1 %v5067_v43 }
 0x669   :  { %4761 = vmatprep.subr.bf16.mxu1 %v5068_v51 }
 0x66c   :  { %4762 = vmatpush3.bf16.msra.mxu1 %v5068_v51 }
 0x66d   :  { %4763 = vmatprep.subr.bf16.mxu1 %v5069_v57 }
 0x670   :  { %4764 = vmatpush3.bf16.msra.mxu1 %v5069_v57 }
 0x671   :  { %4765 = vmatprep.subr.bf16.mxu1 %v5070_v17 }
 0x674   :  { %4766 = vmatpush3.bf16.msra.mxu1 %v5070_v17 }
 0x6e6   :  { %v4641_v45 = vpop.f32.mrf.mxu1 }
 0x6e8   :  { %v2078_v38 = vpop.f32.mrf.mxu1 }
 0x6ea   :  { %v4642_v49 = vpop.f32.mrf.mxu1 }
 0x6eb   :  { %v2142_v62 = vpack.c.bf16 %v4642_v49, %v4641_v45 }
 0x6ec   :  { %v2081_v54 = vpop.f32.mrf.mxu1 }
 0x6ed   :  { %v2141_v21 = vpack.c.bf16 %v2081_v54, %v2078_v38 }
 0x6ee   :  { %v4645_v60 = vpop.f32.mrf.mxu1 }
 0x6ef   :  { %4671 = vmatprep.mubr.bf16.mxu0 %v2141_v21 }
 0x6f0   :  { %v2094_v6 = vpop.f32.mrf.mxu1  ;;  %4672 = vmatmul.mubr.bf16.vlgmr.msra.gmra.mxu0 %v2142_v62 }
 0x6f2   :  { %v4646_v33 = vpop.f32.mrf.mxu1 }
 0x6f3   :  { %v2144_v29 = vpack.c.bf16 %v4646_v33, %v4645_v60 }
 0x6f4   :  { %v2097_v22 = vpop.f32.mrf.mxu1 }
 0x6f5   :  { %v2143_v39 = vpack.c.bf16 %v2097_v22, %v2094_v6 }
 0x6f6   :  { %v4649_v53 = vpop.f32.mrf.mxu1 }
 0x6f7   :  { %4675 = vmatprep.mubr.bf16.mxu0 %v2143_v39 }
 0x6f8   :  { %v2110_v1 = vpop.f32.mrf.mxu1  ;;  %4676 = vmatmul.mubr.bf16.gmra.mxu0 %v2144_v29 }
 0x6fa   :  { %v4650_v28 = vpop.f32.mrf.mxu1 }
 0x6fb   :  { %v2146_v52 = vpack.c.bf16 %v4650_v28, %v4649_v53 }
 0x6fc   :  { %v2113_v20 = vpop.f32.mrf.mxu1 }
 0x6fd   :  { %v2145_v8 = vpack.c.bf16 %v2113_v20, %v2110_v1 }
 0x6fe   :  { %v4653_v40 = vpop.f32.mrf.mxu1 }
 0x6ff   :  { %4679 = vmatprep.mubr.bf16.mxu0 %v2145_v8 }
 0x700   :  { %v2126_v13 = vpop.f32.mrf.mxu1  ;;  %4680 = vmatmul.mubr.bf16.gmra.mxu0 %v2146_v52 }
 0x702   :  { %v4654_v34 = vpop.f32.mrf.mxu1 }
 0x703   :  { %v2148_v55 = vpack.c.bf16 %v4654_v34, %v4653_v40  ;;  %v5073_v40 = vld [vmem:[#allocation8 + $0x268] sm:$0xff]   ;;  %v5075_v34 = vld [vmem:[#allocation8 + $0x258] sm:$0xff]  }
 0x704   :  { %v2129_v47 = vpop.f32.mrf.mxu1 }
 0x705   :  { %v2147_v15 = vpack.c.bf16 %v2129_v47, %v2126_v13  ;;  %4719 = vmatprep.subr.bf16.mxu0 %v2148_v55  ;;  %v5074_v13 = vld [vmem:[#allocation8 + $0x260] sm:$0xff]   ;;  %v5077_v47 = vld [vmem:[#allocation8 + $0x248] sm:$0xff]  }
 0x706   :  { %4720 = vmatpush3.bf16.msra.mxu0 %v2148_v55  ;;  %v4705_v10 = vpop.f32.mrf.mxu1 }
 0x707   :  { %4683 = vmatprep.mubr.bf16.mxu0 %v2147_v15  ;;  %4721 = vmatprep.subr.bf16.mxu0 %v2147_v15 }
 0x708   :  { %4684 = vmatmul.mubr.bf16.gmra.mxu0 %v2148_v55  ;;  %v5076_v55 = vld [vmem:[#allocation8 + $0x250] sm:$0xff]   ;;  %v2393_v41 = vpop.f32.mrf.mxu1 }
 0x709   :  { %4735 = vmatprep.mubr.bf16.mxu0 %v5626_v37 }
 0x70a   :  { %4722 = vmatpush3.bf16.msra.mxu0 %v2147_v15  ;;  %v5078_v15 = vld [vmem:[#allocation8 + $0x240] sm:$0xff]   ;;  %v4706_v56 = vpop.f32.mrf.mxu1 }
 0x70b   :  { %4723 = vmatprep.subr.bf16.mxu0 %v2146_v52 }
 0x70c   :  { %v2396_v24 = vpop.f32.mrf.mxu1 }
 0x70e   :  { %4724 = vmatpush3.bf16.msra.mxu0 %v2146_v52  ;;  %v5072_v52 = vld [vmem:[#allocation8 + $0x270] sm:$0xff]   ;;  %v4709_v43 = vpop.f32.mrf.mxu1 }
 0x70f   :  { %4725 = vmatprep.subr.bf16.mxu0 %v2145_v8 }
 0x710   :  { %v2409_v51 = vpop.f32.mrf.mxu1 }
 0x712   :  { %4726 = vmatpush3.bf16.msra.mxu0 %v2145_v8  ;;  %v5071_v8 = vld [vmem:[#allocation8 + $0x278] sm:$0xff]   ;;  %v4710_v57 = vpop.f32.mrf.mxu1 }
 0x713   :  { %4727 = vmatprep.subr.bf16.mxu0 %v2144_v29  ;;  %4815 = vmatprep.subr.bf16.mxu1 %v5071_v8 }
 0x714   :  { %v2412_v17 = vpop.f32.mrf.mxu1 }
 0x716   :  { %4728 = vmatpush3.bf16.msra.mxu0 %v2144_v29 }
 0x717   :  { %4729 = vmatprep.subr.bf16.mxu0 %v2143_v39 }
 0x71a   :  { %4730 = vmatpush3.bf16.msra.mxu0 %v2143_v39 }
 0x71b   :  { %4731 = vmatprep.subr.bf16.mxu0 %v2142_v62 }
 0x71e   :  { %4732 = vmatpush3.bf16.msra.mxu0 %v2142_v62 }
 0x71f   :  { %4733 = vmatprep.subr.bf16.mxu0 %v2141_v21 }
 0x722   :  { %4734 = vmatpush3.bf16.msra.mxu0 %v2141_v21 }
 0x725   :  { %4736 = vmatmul.mubr.bf16.vlgmr.msra.gmra.mxu0 %v5599_v31 }
 0x726   :  { %4739 = vmatprep.mubr.bf16.mxu0 %v5602_v9 }
 0x72d   :  { %4740 = vmatmul.mubr.bf16.gmra.mxu0 %v5605_v3 }
 0x72e   :  { %4743 = vmatprep.mubr.bf16.mxu0 %v5608_v63 }
 0x735   :  { %4744 = vmatmul.mubr.bf16.gmra.mxu0 %v5611_v5 }
 0x736   :  { %4747 = vmatprep.mubr.bf16.mxu0 %v5614_v23 }
 0x73d   :  { %4748 = vmatmul.mubr.bf16.gmra.mxu0 %v5617_v58 }
 0x73e   :  { %4799 = vmatprep.mubr.bf16.mxu0 %v5626_v37 }
 0x7b0   :  { %v5637_v14 = vpop.f32.mrf.mxu0 }
 0x7b2   :  { %v5639_v19 = vpop.f32.mrf.mxu0 }
 0x7b4   :  { %v5641_v61 = vpop.f32.mrf.mxu0 }
 0x7b6   :  { %v5643_v35 = vpop.f32.mrf.mxu0 }
 0x7b8   :  { %v5645_v16 = vpop.f32.mrf.mxu0 }
 0x7ba   :  { %v5647_v36 = vpop.f32.mrf.mxu0 }
 0x7bc   :  { %v5649_v26 = vpop.f32.mrf.mxu0 }
 0x7be   :  { %v5651_v44 = vpop.f32.mrf.mxu0 }
 0x7c0   :  { %v5653_v12 = vpop.f32.mrf.mxu0 }
 0x7c2   :  { %v5655_v0 = vpop.f32.mrf.mxu0 }
 0x7c4   :  { %v5657_v2 = vpop.f32.mrf.mxu0 }
 0x7c6   :  { %v5659_v30 = vpop.f32.mrf.mxu0 }
 0x7c8   :  { %v5661_v50 = vpop.f32.mrf.mxu0 }
 0x7ca   :  { %v5663_v27 = vpop.f32.mrf.mxu0 }
 0x7cc   :  { %v5665_v42 = vpop.f32.mrf.mxu0 }
 0x7ce   :  { %v5667_v18 = vpop.f32.mrf.mxu0 }
 0x7e5   :  { %v4737_v4 = vpop.f32.mrf.mxu0 }
 0x7e7   :  { %v2490_v59 = vpop.f32.mrf.mxu0 }
 0x7e9   :  { %v4738_v7 = vpop.f32.mrf.mxu0 }
 0x7ea   :  { %v2554_v32 = vpack.c.bf16 %v4738_v7, %v4737_v4  ;;  %v4713_v4 = vpop.f32.mrf.mxu1 }
 0x7eb   :  { %v2493_v25 = vpop.f32.mrf.mxu0 }
 0x7ec   :  { %v2553_v48 = vpack.c.bf16 %v2493_v25, %v2490_v59  ;;  %v2425_v59 = vpop.f32.mrf.mxu1 }
 0x7ed   :  { %v4741_v11 = vpop.f32.mrf.mxu0 }
 0x7ee   :  { %4767 = vmatprep.mubr.bf16.mxu1 %v2553_v48  ;;  %v4714_v7 = vpop.f32.mrf.mxu1 }
 0x7ef   :  { %v2506_v46 = vpop.f32.mrf.mxu0  ;;  %4768 = vmatmul.mubr.bf16.vlgmr.msra.gmra.mxu1 %v2554_v32 }
 0x7f0   :  { %4816 = vmatpush3.bf16.msra.mxu1 %v5071_v8  ;;  %v2428_v25 = vpop.f32.mrf.mxu1 }
 0x7f1   :  { %v4742_v45 = vpop.f32.mrf.mxu0  ;;  %4817 = vmatprep.subr.bf16.mxu1 %v5072_v52 }
 0x7f2   :  { %v2556_v54 = vpack.c.bf16 %v4742_v45, %v4741_v11  ;;  %v2402_v45 = vadd.f32 %v4705_v10, %v5637_v14 }
 0x7f3   :  { %v2509_v38 = vpop.f32.mrf.mxu0 }
 0x7f4   :  { %v2555_v49 = vpack.c.bf16 %v2509_v38, %v2506_v46  ;;  %4818 = vmatpush3.bf16.msra.mxu1 %v5072_v52 }
 0x7f5   :  { %v4745_v21 = vpop.f32.mrf.mxu0  ;;  %4819 = vmatprep.subr.bf16.mxu1 %v5073_v40 }
 0x7f6   :  { %4771 = vmatprep.mubr.bf16.mxu1 %v2555_v49 }
 0x7f7   :  { %v2522_v62 = vpop.f32.mrf.mxu0  ;;  %4772 = vmatmul.mubr.bf16.gmra.mxu1 %v2556_v54 }
 0x7f8   :  { %4820 = vmatpush3.bf16.msra.mxu1 %v5073_v40 }
 0x7f9   :  { %v4746_v60 = vpop.f32.mrf.mxu0  ;;  %4821 = vmatprep.subr.bf16.mxu1 %v5074_v13 }
 0x7fa   :  { %v2558_v22 = vpack.c.bf16 %v4746_v60, %v4745_v21 }
 0x7fb   :  { %v2525_v6 = vpop.f32.mrf.mxu0 }
 0x7fc   :  { %v2557_v33 = vpack.c.bf16 %v2525_v6, %v2522_v62  ;;  %4822 = vmatpush3.bf16.msra.mxu1 %v5074_v13  ;;  %v2405_v62 = vadd.f32 %v4706_v56, %v5641_v61  ;;  %v2421_v61 = vadd.f32 %v4710_v57, %v5649_v26  ;;  %v2437_v26 = vadd.f32 %v4714_v7, %v5657_v2 }
 0x7fd   :  { %v4749_v39 = vpop.f32.mrf.mxu0  ;;  %4823 = vmatprep.subr.bf16.mxu1 %v5075_v34 }
 0x7fe   :  { %4775 = vmatprep.mubr.bf16.mxu1 %v2557_v33 }
 0x7ff   :  { %v2538_v29 = vpop.f32.mrf.mxu0  ;;  %4776 = vmatmul.mubr.bf16.gmra.mxu1 %v2558_v22 }
 0x800   :  { %4824 = vmatpush3.bf16.msra.mxu1 %v5075_v34 }
 0x801   :  { %v4750_v53 = vpop.f32.mrf.mxu0  ;;  %4825 = vmatprep.subr.bf16.mxu1 %v5076_v55 }
 0x802   :  { %v2560_v1 = vpack.c.bf16 %v4750_v53, %v4749_v39 }
 0x803   :  { %v2541_v28 = vpop.f32.mrf.mxu0 }
 0x804   :  { %v2559_v20 = vpack.c.bf16 %v2541_v28, %v2538_v29  ;;  %4783 = vmatprep.subr.bf16.mxu0 %v2560_v1  ;;  %4826 = vmatpush3.bf16.msra.mxu1 %v5076_v55  ;;  %v2418_v29 = vadd.f32 %v4709_v43, %v5645_v16  ;;  %v2434_v16 = vadd.f32 %v4713_v4, %v5653_v12 }
 0x805   :  { %4784 = vmatpush3.bf16.msra.mxu0 %v2560_v1  ;;  %4827 = vmatprep.subr.bf16.mxu1 %v5077_v47 }
 0x806   :  { %4779 = vmatprep.mubr.bf16.mxu1 %v2559_v20  ;;  %4785 = vmatprep.subr.bf16.mxu0 %v2559_v20 }
 0x807   :  { %4780 = vmatmul.mubr.bf16.gmra.mxu1 %v2560_v1 }
 0x808   :  { %4828 = vmatpush3.bf16.msra.mxu1 %v5077_v47 }
 0x809   :  { %4786 = vmatpush3.bf16.msra.mxu0 %v2559_v20  ;;  %4829 = vmatprep.subr.bf16.mxu1 %v5078_v15 }
 0x80a   :  { %4787 = vmatprep.subr.bf16.mxu0 %v2558_v22 }
 0x80c   :  { %4830 = vmatpush3.bf16.msra.mxu1 %v5078_v15 }
 0x80d   :  { %4788 = vmatpush3.bf16.msra.mxu0 %v2558_v22 }
 0x80e   :  { %4789 = vmatprep.subr.bf16.mxu0 %v2557_v33 }
 0x811   :  { %4790 = vmatpush3.bf16.msra.mxu0 %v2557_v33  ;;  %v2397_v33 = vadd.f32 %v2396_v24, %v5643_v35  ;;  %v2413_v35 = vadd.f32 %v2412_v17, %v5651_v44  ;;  %v2429_v44 = vadd.f32 %v2428_v25, %v5659_v30 }
 0x812   :  { %4791 = vmatprep.subr.bf16.mxu0 %v2556_v54 }
 0x815   :  { %4792 = vmatpush3.bf16.msra.mxu0 %v2556_v54 }
 0x816   :  { %4793 = vmatprep.subr.bf16.mxu0 %v2555_v49 }
 0x819   :  { %4794 = vmatpush3.bf16.msra.mxu0 %v2555_v49  ;;  %v2394_v49 = vadd.f32 %v2393_v41, %v5639_v19  ;;  %v2410_v19 = vadd.f32 %v2409_v51, %v5647_v36  ;;  %v2426_v36 = vadd.f32 %v2425_v59, %v5655_v0 }
 0x81a   :  { %4795 = vmatprep.subr.bf16.mxu0 %v2554_v32 }
 0x81d   :  { %4796 = vmatpush3.bf16.msra.mxu0 %v2554_v32 }
 0x81e   :  { %4797 = vmatprep.subr.bf16.mxu0 %v2553_v48 }
 0x821   :  { %4798 = vmatpush3.bf16.msra.mxu0 %v2553_v48  ;;  %v4717_v48 = vpop.f32.mrf.mxu1 }
 0x822   :  { %v2450_v12 = vadd.f32 %v4717_v48, %v5661_v50 }
 0x823   :  { %v2441_v32 = vpop.f32.mrf.mxu1 }
 0x824   :  { %4800 = vmatmul.mubr.bf16.vlgmr.msra.gmra.mxu0 %v5599_v31  ;;  %v2442_v0 = vadd.f32 %v2441_v32, %v5663_v27 }
 0x825   :  { %4803 = vmatprep.mubr.bf16.mxu0 %v5602_v9  ;;  %v4718_v11 = vpop.f32.mrf.mxu1 }
 0x826   :  { %v2453_v2 = vadd.f32 %v4718_v11, %v5665_v42 }
 0x827   :  { %v5677_v46 = vpop.f32.mrf.mxu1 }
 0x82c   :  { %4804 = vmatmul.mubr.bf16.gmra.mxu0 %v5605_v3 }
 0x82d   :  { %4807 = vmatprep.mubr.bf16.mxu0 %v5608_v63 }
 0x834   :  { %4808 = vmatmul.mubr.bf16.gmra.mxu0 %v5611_v5 }
 0x835   :  { %4811 = vmatprep.mubr.bf16.mxu0 %v5614_v23 }
 0x83c   :  { %4812 = vmatmul.mubr.bf16.gmra.mxu0 %v5617_v58 }
 0x83d   :  { %4863 = vmatprep.mubr.bf16.mxu0 %v5626_v37 }
 0x8af   :  { %v4769_v38 = vpop.f32.mrf.mxu1 }
 0x8b0   :  { %v5681_v54 = vadd.f32 %v4769_v38, %v2402_v45 }
 0x8b1   :  { %v2660_v21 = vpop.f32.mrf.mxu1 }
 0x8b2   :  { %v5684_v60 = vadd.f32 %v2660_v21, %v2394_v49 }
 0x8b3   :  { %v4770_v6 = vpop.f32.mrf.mxu1 }
 0x8b4   :  { %v5687_v22 = vadd.f32 %v4770_v6, %v2405_v62 }
 0x8b5   :  { %v2663_v39 = vpop.f32.mrf.mxu1 }
 0x8b6   :  { %v5690_v53 = vadd.f32 %v2663_v39, %v2397_v33 }
 0x8b7   :  { %v4773_v14 = vpop.f32.mrf.mxu1 }
 0x8b8   :  { %v5693_v1 = vadd.f32 %v4773_v14, %v2418_v29 }
 0x8b9   :  { %v2676_v28 = vpop.f32.mrf.mxu1 }
 0x8ba   :  { %v5696_v20 = vadd.f32 %v2676_v28, %v2410_v19 }
 0x8bb   :  { %v4774_v8 = vpop.f32.mrf.mxu1 }
 0x8bc   :  { %v5699_v52 = vadd.f32 %v4774_v8, %v2421_v61 }
 0x8bd   :  { %v2679_v40 = vpop.f32.mrf.mxu1 }
 0x8be   :  { %v5702_v13 = vadd.f32 %v2679_v40, %v2413_v35  ;;  %v5079_v40 = vld [vmem:[#allocation8 + $0x2b8] sm:$0xff]  }
 0x8bf   :  { %v4777_v34 = vpop.f32.mrf.mxu1  ;;  %4879 = vmatprep.subr.bf16.mxu1 %v5079_v40 }
 0x8c0   :  { %v5705_v55 = vadd.f32 %v4777_v34, %v2434_v16  ;;  %v5080_v16 = vld [vmem:[#allocation8 + $0x2b0] sm:$0xff]   ;;  %v5081_v34 = vld [vmem:[#allocation8 + $0x2a8] sm:$0xff]  }
 0x8c1   :  { %v2692_v47 = vpop.f32.mrf.mxu1 }
 0x8c2   :  { %v5708_v15 = vadd.f32 %v2692_v47, %v2426_v36  ;;  %v5082_v36 = vld [vmem:[#allocation8 + $0x2a0] sm:$0xff]   ;;  %v5083_v47 = vld [vmem:[#allocation8 + $0x298] sm:$0xff]  }
 0x8c3   :  { %v4778_v10 = vpop.f32.mrf.mxu1 }
 0x8c4   :  { %v5711_v41 = vadd.f32 %v4778_v10, %v2437_v26  ;;  %v5084_v26 = vld [vmem:[#allocation8 + $0x290] sm:$0xff]   ;;  %v5085_v10 = vld [vmem:[#allocation8 + $0x288] sm:$0xff]  }
 0x8c5   :  { %v2695_v56 = vpop.f32.mrf.mxu1 }
 0x8c6   :  { %v5714_v24 = vadd.f32 %v2695_v56, %v2429_v44 }
 0x8c7   :  { %v4781_v43 = vpop.f32.mrf.mxu1 }
 0x8c8   :  { %v5717_v51 = vadd.f32 %v4781_v43, %v2450_v12 }
 0x8c9   :  { %v2708_v57 = vpop.f32.mrf.mxu1 }
 0x8ca   :  { %v5720_v17 = vadd.f32 %v2708_v57, %v2442_v0 }
 0x8cb   :  { %v4782_v4 = vpop.f32.mrf.mxu1 }
 0x8cc   :  { %v5722_v59 = vadd.f32 %v4782_v4, %v2453_v2 }
 0x8e4   :  { %v4801_v30 = vpop.f32.mrf.mxu0 }
 0x8e6   :  { %v2773_v7 = vpop.f32.mrf.mxu0 }
 0x8e8   :  { %v4802_v25 = vpop.f32.mrf.mxu0 }
 0x8e9   :  { %v2837_v48 = vpack.c.bf16 %v4802_v25, %v4801_v30 }
 0x8ea   :  { %v2776_v45 = vpop.f32.mrf.mxu0 }
 0x8eb   :  { %v2836_v50 = vpack.c.bf16 %v2776_v45, %v2773_v7 }
 0x8ec   :  { %v4805_v38 = vpop.f32.mrf.mxu0 }
 0x8ed   :  { %4831 = vmatprep.mubr.bf16.mxu1 %v2836_v50 }
 0x8ee   :  { %v2789_v49 = vpop.f32.mrf.mxu0  ;;  %4832 = vmatmul.mubr.bf16.vlgmr.msra.gmra.mxu1 %v2837_v48 }
 0x8ef   :  { %4880 = vmatpush3.bf16.msra.mxu1 %v5079_v40 }
 0x8f0   :  { %v4806_v27 = vpop.f32.mrf.mxu0  ;;  %4881 = vmatprep.subr.bf16.mxu1 %v5080_v16 }
 0x8f1   :  { %v2839_v62 = vpack.c.bf16 %v4806_v27, %v4805_v38 }
 0x8f2   :  { %v2792_v32 = vpop.f32.mrf.mxu0 }
 0x8f3   :  { %v2838_v21 = vpack.c.bf16 %v2792_v32, %v2789_v49  ;;  %4882 = vmatpush3.bf16.msra.mxu1 %v5080_v16 }
 0x8f4   :  { %v4809_v42 = vpop.f32.mrf.mxu0  ;;  %4883 = vmatprep.subr.bf16.mxu1 %v5081_v34 }
 0x8f5   :  { %4835 = vmatprep.mubr.bf16.mxu1 %v2838_v21 }
 0x8f6   :  { %v2805_v11 = vpop.f32.mrf.mxu0  ;;  %4836 = vmatmul.mubr.bf16.gmra.mxu1 %v2839_v62 }
 0x8f7   :  { %4884 = vmatpush3.bf16.msra.mxu1 %v5081_v34 }
 0x8f8   :  { %v4810_v6 = vpop.f32.mrf.mxu0  ;;  %4885 = vmatprep.subr.bf16.mxu1 %v5082_v36 }
 0x8f9   :  { %v2841_v29 = vpack.c.bf16 %v4810_v6, %v4809_v42 }
 0x8fa   :  { %v2808_v33 = vpop.f32.mrf.mxu0 }
 0x8fb   :  { %v2840_v39 = vpack.c.bf16 %v2808_v33, %v2805_v11  ;;  %4886 = vmatpush3.bf16.msra.mxu1 %v5082_v36 }
 0x8fc   :  { %v4813_v14 = vpop.f32.mrf.mxu0  ;;  %4887 = vmatprep.subr.bf16.mxu1 %v5083_v47 }
 0x8fd   :  { %4839 = vmatprep.mubr.bf16.mxu1 %v2840_v39 }
 0x8fe   :  { %v2821_v19 = vpop.f32.mrf.mxu0  ;;  %4840 = vmatmul.mubr.bf16.gmra.mxu1 %v2841_v29 }
 0x8ff   :  { %4888 = vmatpush3.bf16.msra.mxu1 %v5083_v47 }
 0x900   :  { %v4814_v28 = vpop.f32.mrf.mxu0  ;;  %4889 = vmatprep.subr.bf16.mxu1 %v5084_v26 }
 0x901   :  { %v2843_v61 = vpack.c.bf16 %v4814_v28, %v4813_v14  ;;  %v5089_v14 = vld [vmem:[#allocation8 + $0x2e8] sm:$0xff]  }
 0x902   :  { %v2824_v8 = vpop.f32.mrf.mxu0 }
 0x903   :  { %v2842_v35 = vpack.c.bf16 %v2824_v8, %v2821_v19  ;;  %4847 = vmatprep.subr.bf16.mxu0 %v2843_v61  ;;  %4890 = vmatpush3.bf16.msra.mxu1 %v5084_v26 }
 0x904   :  { %4848 = vmatpush3.bf16.msra.mxu0 %v2843_v61  ;;  %4891 = vmatprep.subr.bf16.mxu1 %v5085_v10 }
 0x905   :  { %4843 = vmatprep.mubr.bf16.mxu1 %v2842_v35  ;;  %4849 = vmatprep.subr.bf16.mxu0 %v2842_v35 }
 0x906   :  { %4844 = vmatmul.mubr.bf16.gmra.mxu1 %v2843_v61 }
 0x907   :  { %4892 = vmatpush3.bf16.msra.mxu1 %v5085_v10 }
 0x908   :  { %4850 = vmatpush3.bf16.msra.mxu0 %v2842_v35 }
 0x909   :  { %4851 = vmatprep.subr.bf16.mxu0 %v2841_v29 }
 0x90c   :  { %4852 = vmatpush3.bf16.msra.mxu0 %v2841_v29  ;;  %v5088_v29 = vld [vmem:[#allocation8 + $0x2f0] sm:$0xff]  }
 0x90d   :  { %4853 = vmatprep.subr.bf16.mxu0 %v2840_v39 }
 0x910   :  { %4854 = vmatpush3.bf16.msra.mxu0 %v2840_v39  ;;  %v5087_v39 = vld [vmem:[#allocation8 + $0x2f8] sm:$0xff]  }
 0x911   :  { %4855 = vmatprep.subr.bf16.mxu0 %v2839_v62 }
 0x914   :  { %4856 = vmatpush3.bf16.msra.mxu0 %v2839_v62 }
 0x915   :  { %4857 = vmatprep.subr.bf16.mxu0 %v2838_v21 }
 0x918   :  { %4858 = vmatpush3.bf16.msra.mxu0 %v2838_v21 }
 0x919   :  { %4859 = vmatprep.subr.bf16.mxu0 %v2837_v48 }
 0x91c   :  { %4860 = vmatpush3.bf16.msra.mxu0 %v2837_v48 }
 0x91d   :  { %4861 = vmatprep.subr.bf16.mxu0 %v2836_v50 }
 0x920   :  { %4862 = vmatpush3.bf16.msra.mxu0 %v2836_v50 }
 0x923   :  { %4864 = vmatmul.mubr.bf16.vlgmr.msra.gmra.mxu0 %v5599_v31 }
 0x924   :  { %4867 = vmatprep.mubr.bf16.mxu0 %v5602_v9 }
 0x92b   :  { %4868 = vmatmul.mubr.bf16.gmra.mxu0 %v5605_v3 }
 0x92c   :  { %4871 = vmatprep.mubr.bf16.mxu0 %v5608_v63 }
 0x933   :  { %4872 = vmatmul.mubr.bf16.gmra.mxu0 %v5611_v5 }
 0x934   :  { %4875 = vmatprep.mubr.bf16.mxu0 %v5614_v23 }
 0x93b   :  { %4876 = vmatmul.mubr.bf16.gmra.mxu0 %v5617_v58 }
 0x93c   :  { %4927 = vmatprep.mubr.bf16.mxu0 %v5626_v37  ;;  %v5086_v37 = vld [vmem:[#allocation8 + $0x280] sm:$0xff]  }
 0x93d   :  { %4893 = vmatprep.subr.bf16.mxu1 %v5086_v37 }
 0x93e   :  { %4894 = vmatpush3.bf16.msra.mxu1 %v5086_v37 }
 0x93f   :  { %4943 = vmatprep.subr.bf16.mxu1 %v5087_v39 }
 0x9e3   :  { %v4865_v44 = vpop.f32.mrf.mxu0 }
 0x9e5   :  { %v3056_v56 = vpop.f32.mrf.mxu0 }
 0x9e7   :  { %v4866_v12 = vpop.f32.mrf.mxu0 }
 0x9e8   :  { %v3120_v57 = vpack.c.bf16 %v4866_v12, %v4865_v44 }
 0x9e9   :  { %v3059_v43 = vpop.f32.mrf.mxu0 }
 0x9ea   :  { %v3119_v0 = vpack.c.bf16 %v3059_v43, %v3056_v56 }
 0x9eb   :  { %v4869_v2 = vpop.f32.mrf.mxu0 }
 0x9ec   :  { %4895 = vmatprep.mubr.bf16.mxu1 %v3119_v0 }
 0x9ed   :  { %v3072_v4 = vpop.f32.mrf.mxu0  ;;  %4896 = vmatmul.mubr.bf16.vlgmr.msra.gmra.mxu1 %v3120_v57 }
 0x9ee   :  { %4944 = vmatpush3.bf16.msra.mxu1 %v5087_v39 }
 0x9ef   :  { %v4870_v30 = vpop.f32.mrf.mxu0  ;;  %4945 = vmatprep.subr.bf16.mxu1 %v5088_v29 }
 0x9f0   :  { %v3122_v45 = vpack.c.bf16 %v4870_v30, %v4869_v2 }
 0x9f1   :  { %v3075_v7 = vpop.f32.mrf.mxu0 }
 0x9f2   :  { %v3121_v25 = vpack.c.bf16 %v3075_v7, %v3072_v4  ;;  %4946 = vmatpush3.bf16.msra.mxu1 %v5088_v29  ;;  %v5739_v7 = vpop.f32.mrf.mxu1 }
 0x9f3   :  { %v4873_v50 = vpop.f32.mrf.mxu0  ;;  %4947 = vmatprep.subr.bf16.mxu1 %v5089_v14 }
 0x9f4   :  { %4899 = vmatprep.mubr.bf16.mxu1 %v3121_v25 }
 0x9f5   :  { %v3088_v48 = vpop.f32.mrf.mxu0  ;;  %4900 = vmatmul.mubr.bf16.gmra.mxu1 %v3122_v45 }
 0x9f6   :  { %4948 = vmatpush3.bf16.msra.mxu1 %v5089_v14 }
 0x9f7   :  { %v4874_v38 = vpop.f32.mrf.mxu0 }
 0x9f8   :  { %v3124_v32 = vpack.c.bf16 %v4874_v38, %v4873_v50 }
 0x9f9   :  { %v3091_v49 = vpop.f32.mrf.mxu0 }
 0x9fa   :  { %v3123_v27 = vpack.c.bf16 %v3091_v49, %v3088_v48 }
 0x9fb   :  { %v4877_v21 = vpop.f32.mrf.mxu0 }
 0x9fc   :  { %4903 = vmatprep.mubr.bf16.mxu1 %v3123_v27 }
 0x9fd   :  { %v3104_v62 = vpop.f32.mrf.mxu0  ;;  %4904 = vmatmul.mubr.bf16.gmra.mxu1 %v3124_v32 }
 0x9ff   :  { %v4878_v42 = vpop.f32.mrf.mxu0 }
 0xa00   :  { %v3126_v11 = vpack.c.bf16 %v4878_v42, %v4877_v21 }
 0xa01   :  { %v3107_v6 = vpop.f32.mrf.mxu0 }
 0xa02   :  { %v3125_v33 = vpack.c.bf16 %v3107_v6, %v3104_v62  ;;  %4911 = vmatprep.subr.bf16.mxu0 %v3126_v11 }
 0xa03   :  { %4912 = vmatpush3.bf16.msra.mxu0 %v3126_v11 }
 0xa04   :  { %4907 = vmatprep.mubr.bf16.mxu1 %v3125_v33  ;;  %4913 = vmatprep.subr.bf16.mxu0 %v3125_v33 }
 0xa05   :  { %4908 = vmatmul.mubr.bf16.gmra.mxu1 %v3126_v11 }
 0xa07   :  { %4914 = vmatpush3.bf16.msra.mxu0 %v3125_v33 }
 0xa08   :  { %4915 = vmatprep.subr.bf16.mxu0 %v3124_v32 }
 0xa0b   :  { %4916 = vmatpush3.bf16.msra.mxu0 %v3124_v32 }
 0xa0c   :  { %4917 = vmatprep.subr.bf16.mxu0 %v3123_v27 }
 0xa0f   :  { %4918 = vmatpush3.bf16.msra.mxu0 %v3123_v27 }
 0xa10   :  { %4919 = vmatprep.subr.bf16.mxu0 %v3122_v45 }
 0xa13   :  { %4920 = vmatpush3.bf16.msra.mxu0 %v3122_v45 }
 0xa14   :  { %4921 = vmatprep.subr.bf16.mxu0 %v3121_v25 }
 0xa17   :  { %4922 = vmatpush3.bf16.msra.mxu0 %v3121_v25  ;;  %v4833_v25 = vpop.f32.mrf.mxu1 }
 0xa18   :  { %4923 = vmatprep.subr.bf16.mxu0 %v3120_v57 }
 0xa19   :  { %v2943_v45 = vpop.f32.mrf.mxu1 }
 0xa1b   :  { %4924 = vmatpush3.bf16.msra.mxu0 %v3120_v57  ;;  %v4834_v50 = vpop.f32.mrf.mxu1 }
 0xa1c   :  { %4925 = vmatprep.subr.bf16.mxu0 %v3119_v0 }
 0xa1d   :  { %v2946_v48 = vpop.f32.mrf.mxu1 }
 0xa1f   :  { %4926 = vmatpush3.bf16.msra.mxu0 %v3119_v0  ;;  %v4837_v38 = vpop.f32.mrf.mxu1 }
 0xa21   :  { %v2959_v49 = vpop.f32.mrf.mxu1 }
 0xa22   :  { %4928 = vmatmul.mubr.bf16.vlgmr.msra.gmra.mxu0 %v5599_v31  ;;  %v5090_v31 = vld [vmem:[#allocation8 + $0x2e0] sm:$0xff]  }
 0xa23   :  { %4931 = vmatprep.mubr.bf16.mxu0 %v5602_v9  ;;  %4949 = vmatprep.subr.bf16.mxu1 %v5090_v31  ;;  %v5091_v9 = vld [vmem:[#allocation8 + $0x2d8] sm:$0xff]   ;;  %v4838_v27 = vpop.f32.mrf.mxu1 }
 0xa24   :  { %4950 = vmatpush3.bf16.msra.mxu1 %v5090_v31 }
 0xa25   :  { %4951 = vmatprep.subr.bf16.mxu1 %v5091_v9  ;;  %v5741_v32 = vpop.f32.mrf.mxu1 }
 0xa27   :  { %v5743_v21 = vpop.f32.mrf.mxu1 }
 0xa28   :  { %4952 = vmatpush3.bf16.msra.mxu1 %v5091_v9 }
 0xa29   :  { %v5745_v62 = vpop.f32.mrf.mxu1 }
 0xa2a   :  { %4932 = vmatmul.mubr.bf16.gmra.mxu0 %v5605_v3  ;;  %v5092_v3 = vld [vmem:[#allocation8 + $0x2d0] sm:$0xff]  }
 0xa2b   :  { %4935 = vmatprep.mubr.bf16.mxu0 %v5608_v63  ;;  %4953 = vmatprep.subr.bf16.mxu1 %v5092_v3  ;;  %v5093_v63 = vld [vmem:[#allocation8 + $0x2c8] sm:$0xff]   ;;  %v5747_v42 = vpop.f32.mrf.mxu1 }
 0xa2c   :  { %4954 = vmatpush3.bf16.msra.mxu1 %v5092_v3 }
 0xa2d   :  { %4955 = vmatprep.subr.bf16.mxu1 %v5093_v63  ;;  %v5749_v11 = vpop.f32.mrf.mxu1 }
 0xa2f   :  { %v5751_v6 = vpop.f32.mrf.mxu1 }
 0xa30   :  { %4956 = vmatpush3.bf16.msra.mxu1 %v5093_v63 }
 0xa31   :  { %v5753_v33 = vpop.f32.mrf.mxu1 }
 0xa32   :  { %4936 = vmatmul.mubr.bf16.gmra.mxu0 %v5611_v5  ;;  %v5094_v5 = vld [vmem:[#allocation8 + $0x2c0] sm:$0xff]  }
 0xa33   :  { %4939 = vmatprep.mubr.bf16.mxu0 %v5614_v23  ;;  %4957 = vmatprep.subr.bf16.mxu1 %v5094_v5  ;;  %v5755_v39 = vpop.f32.mrf.mxu1 }
 0xa34   :  { %4958 = vmatpush3.bf16.msra.mxu1 %v5094_v5 }
 0xa35   :  { %v5757_v29 = vpop.f32.mrf.mxu1 }
 0xa3a   :  { %4940 = vmatmul.mubr.bf16.gmra.mxu0 %v5617_v58 }
 0xaad   :  { %v4897_v14 = vpop.f32.mrf.mxu1 }
 0xaaf   :  { %v3226_v31 = vpop.f32.mrf.mxu1 }
 0xab1   :  { %v4898_v9 = vpop.f32.mrf.mxu1 }
 0xab3   :  { %v3229_v3 = vpop.f32.mrf.mxu1 }
 0xab5   :  { %v4901_v63 = vpop.f32.mrf.mxu1 }
 0xab7   :  { %v3242_v5 = vpop.f32.mrf.mxu1 }
 0xae2   :  { %v4929_v23 = vpop.f32.mrf.mxu0 }
 0xae4   :  { %v3339_v58 = vpop.f32.mrf.mxu0 }
 0xae6   :  { %v4930_v19 = vpop.f32.mrf.mxu0 }
 0xae7   :  { %v3403_v8 = vpack.c.bf16 %v4930_v19, %v4929_v23  ;;  %v4902_v23 = vpop.f32.mrf.mxu1 }
 0xae8   :  { %v3342_v28 = vpop.f32.mrf.mxu0 }
 0xae9   :  { %v3402_v61 = vpack.c.bf16 %v3342_v28, %v3339_v58  ;;  %v5759_v58 = vpop.f32.mrf.mxu1 }
 0xaea   :  { %v4933_v35 = vpop.f32.mrf.mxu0 }
 0xaeb   :  { %4959 = vmatprep.mubr.bf16.mxu1 %v3402_v61  ;;  %v5761_v19 = vpop.f32.mrf.mxu1 }
 0xaec   :  { %v3355_v40 = vpop.f32.mrf.mxu0  ;;  %4960 = vmatmul.mubr.bf16.vlgmr.msra.gmra.mxu1 %v3403_v8 }
 0xaed   :  { %v5763_v28 = vpop.f32.mrf.mxu1 }
 0xaee   :  { %v4934_v16 = vpop.f32.mrf.mxu0 }
 0xaef   :  { %v3405_v47 = vpack.c.bf16 %v4934_v16, %v4933_v35  ;;  %v5765_v61 = vpop.f32.mrf.mxu1 }
 0xaf0   :  { %v3358_v34 = vpop.f32.mrf.mxu0 }
 0xaf1   :  { %v3404_v36 = vpack.c.bf16 %v3358_v34, %v3355_v40  ;;  %v5767_v8 = vpop.f32.mrf.mxu1  ;;  %v3008_v34 = vadd.f32 %v4833_v25, %v5681_v54 }
 0xaf2   :  { %v4937_v26 = vpop.f32.mrf.mxu0 }
 0xaf3   :  { %4963 = vmatprep.mubr.bf16.mxu1 %v3404_v36  ;;  %v5769_v35 = vpop.f32.mrf.mxu1 }
 0xaf4   :  { %v3371_v10 = vpop.f32.mrf.mxu0  ;;  %4964 = vmatmul.mubr.bf16.gmra.mxu1 %v3405_v47  ;;  %v3006_v47 = vadd.f32 %v2943_v45, %v5684_v60  ;;  %v3012_v60 = vadd.f32 %v4837_v38, %v5693_v1 }
 0xaf5   :  { %v5771_v40 = vpop.f32.mrf.mxu1 }
 0xaf6   :  { %v4938_v37 = vpop.f32.mrf.mxu0 }
 0xaf7   :  { %v3407_v12 = vpack.c.bf16 %v4938_v37, %v4937_v26  ;;  %v5773_v16 = vpop.f32.mrf.mxu1  ;;  %v3291_v26 = vadd.f32 %v4897_v14, %v3008_v34  ;;  %v5782_v37 = vld [vmem:[%s5840_s3 + $0x1] ss:$0 sm:$0xff]  ;;  %v3010_v14 = vadd.f32 %v2959_v49, %v5696_v20  ;;  %s5196_s3 = smov [#allocation10]  }
 0xaf8   :  { %v3374_v44 = vpop.f32.mrf.mxu0  ;;  %s3681_s7 = sshll.u32 %s5196_s3, 4  ;;  %s3682_s7 = int_to_ptr.vmem [resolvable:$true] %s3681_s7 }
 0xaf9   :  { %v3406_v56 = vpack.c.bf16 %v3374_v44, %v3371_v10  ;;  %v5776_v36 = vpop.f32.mrf.mxu1  ;;  %v3009_v44 = vadd.f32 %v4834_v50, %v5687_v22  ;;  %v3295_v50 = vadd.f32 %v4901_v63, %v3012_v60  ;;  %s5163_s8 = scalar_lea.vmem %s3682_s7, 2048  ;;  %p5168_p2 = scmp.lt.s32.totalorder %s3682_s7, %s3682_s7 }
 0xafa   :  { %v4941_v43 = vpop.f32.mrf.mxu0  ;;  %p5164_p1 = scmp.ne.s32.totalorder %s3682_s7, %s5163_s8  ;;  %p5169_p3 = scmp.lt.s32.totalorder %s5163_s8, %s5163_s8 }
 0xafb   :  { %4967 = vmatprep.mubr.bf16.mxu1 %v3406_v56  ;;  %v3289_v56 = vadd.f32 %v3226_v31, %v3006_v47 }
 0xafc   :  { %v3387_v0 = vpop.f32.mrf.mxu0  ;;  %4968 = vmatmul.mubr.bf16.gmra.mxu1 %v3407_v12  ;;  %p5170_p4 = por %p5169_p3, %p5168_p2 }
 0xafe   :  { %v4942_v57 = vpop.f32.mrf.mxu0  ;;  %p5171_p5 = pnand %p5170_p4, %p5164_p1 }
 0xaff   :  { %v3409_v30 = vpack.c.bf16 %v4942_v57, %v4941_v43 }
 0xb00   :  { %v3390_v2 = vpop.f32.mrf.mxu0 }
 0xb01   :  { %v3408_v4 = vpack.c.bf16 %v3390_v2, %v3387_v0  ;;  %v3292_v0 = vadd.f32 %v4898_v9, %v3009_v44  ;;  %v3007_v2 = vadd.f32 %v2946_v48, %v5690_v53  ;;  %v3013_v53 = vadd.f32 %v4838_v27, %v5699_v52 }
 0xb02   :  { %v3293_v48 = vadd.f32 %v3242_v5, %v3010_v14  ;;  %v3011_v52 = vadd.f32 %v5741_v32, %v5702_v13  ;;  %v3016_v27 = vadd.f32 %v5743_v21, %v5705_v55 }
 0xb03   :  { %4971 = vmatprep.mubr.bf16.mxu1 %v3408_v4  ;;  %v3290_v22 = vadd.f32 %v3229_v3, %v3007_v2  ;;  %v3296_v3 = vadd.f32 %v4902_v23, %v3013_v53  ;;  %v3014_v23 = vadd.f32 %v5745_v62, %v5708_v15 }
 0xb04   :  { %4972 = vmatmul.mubr.bf16.gmra.mxu1 %v3409_v30  ;;  %v3294_v2 = vadd.f32 %v5759_v58, %v3011_v52  ;;  %v3299_v60 = vadd.f32 %v5761_v19, %v3016_v27 }
 0xbac   :  { %v4961_v10 = vpop.f32.mrf.mxu1 }
 0xbad   :  { %v3574_v12 = vadd.f32 %v4961_v10, %v3291_v26 }
 0xbae   :  { %v3509_v43 = vpop.f32.mrf.mxu1 }
 0xbaf   :  { %v3598_v57 = vadd.f32 %v5782_v37, %v3574_v12  ;;  %v3572_v54 = vadd.f32 %v3509_v43, %v3289_v56 }
 0xbb0   :  { %v4962_v4 = vpop.f32.mrf.mxu1 }
 0xbb1   :  { %vm3614_vm0 = vcmp.ge.f32.partialorder %v3598_v57, 0.0  ;;  %v3630_v30 = vmul.f32 0.01, %v3598_v57  ;;  %v3596_v25 = vadd.f32 %v5782_v37, %v3572_v54  ;;  %v3575_v45 = vadd.f32 %v4962_v4, %v3292_v0 }
 0xbb2   :  { %v3512_v31 = vpop.f32.mrf.mxu1 }
 0xbb3   :  { %v3646_v34 = vsel %vm3614_vm0, %v3598_v57, %v3630_v30  ;;  %vm3612_vm1 = vcmp.ge.f32.partialorder %v3596_v25, 0.0  ;;  %v3628_v9 = vmul.f32 0.01, %v3596_v25  ;;  %v3599_v47 = vadd.f32 %v5782_v37, %v3575_v45 }
 0xbb4   :  { %3662 = vst [vmem:[#allocation10 + $0x10] sm:$0xff] %v3646_v34  ;;  %v3573_v1 = vadd.f32 %v3512_v31, %v3290_v22  ;;  %v4965_v38 = vpop.f32.mrf.mxu1  ;;  %v3017_v30 = vadd.f32 %v5747_v42, %v5711_v41  ;;  %v3015_v41 = vadd.f32 %v5749_v11, %v5714_v24  ;;  %v3020_v42 = vadd.f32 %v5751_v6, %v5717_v51 }
 0xbb5   :  { %v3644_v26 = vsel %vm3612_vm1, %v3596_v25, %v3628_v9  ;;  %vm3615_vm2 = vcmp.ge.f32.partialorder %v3599_v47, 0.0  ;;  %v3631_v10 = vmul.f32 0.01, %v3599_v47  ;;  %v3578_v44 = vadd.f32 %v4965_v38, %v3295_v50 }
 0xbb6   :  { %3660 = vst [vmem:[#allocation10] sm:$0xff] %v3644_v26  ;;  %v3597_v20 = vadd.f32 %v5782_v37, %v3573_v1  ;;  %v3525_v49 = vpop.f32.mrf.mxu1  ;;  %v3297_v25 = vadd.f32 %v5763_v28, %v3014_v23  ;;  %v3300_v50 = vadd.f32 %v5765_v61, %v3017_v30  ;;  %v3018_v61 = vadd.f32 %v5753_v33, %v5720_v17 }
 0xbb7   :  { %v3647_v63 = vsel %vm3615_vm2, %v3599_v47, %v3631_v10  ;;  %v3602_v56 = vadd.f32 %v5782_v37, %v3578_v44  ;;  %v3576_v12 = vadd.f32 %v3525_v49, %v3293_v48  ;;  %v3298_v38 = vadd.f32 %v5767_v8, %v3015_v41 }
 0xbb8   :  { %3663 = vst [vmem:[#allocation10 + $0x18] sm:$0xff] %v3647_v63  ;;  %vm3613_vm3 = vcmp.ge.f32.partialorder %v3597_v20, 0.0  ;;  %v3629_v5 = vmul.f32 0.01, %v3597_v20  ;;  %v4966_v43 = vpop.f32.mrf.mxu1  ;;  %v3303_v26 = vadd.f32 %v5769_v35, %v3020_v42  ;;  %v2445_v44 = vadd.f32 %v5677_v46, %v5667_v18 }
 0xbb9   :  { %vm3618_vm4 = vcmp.ge.f32.partialorder %v3602_v56, 0.0  ;;  %v3634_v0 = vmul.f32 0.01, %v3602_v56  ;;  %v3600_v57 = vadd.f32 %v5782_v37, %v3576_v12  ;;  %v3579_v54 = vadd.f32 %v4966_v43, %v3296_v3 }
 0xbba   :  { %v3645_v13 = vsel %vm3613_vm3, %v3597_v20, %v3629_v5  ;;  %v3528_v32 = vpop.f32.mrf.mxu1  ;;  %v3021_v20 = vadd.f32 %v5755_v39, %v5722_v59  ;;  %v3301_v17 = vadd.f32 %v5771_v40, %v3018_v61  ;;  %v2736_v63 = vadd.f32 %v5739_v7, %v2445_v44 }
 0xbbb   :  { %3661 = vst [vmem:[#allocation10 + $0x8] sm:$0xff] %v3645_v13  ;;  %v3650_v55 = vsel %vm3618_vm4, %v3602_v56, %v3634_v0  ;;  %vm3616_vm5 = vcmp.ge.f32.partialorder %v3600_v57, 0.0  ;;  %v3632_v21 = vmul.f32 0.01, %v3600_v57  ;;  %v3603_v4 = vadd.f32 %v5782_v37, %v3579_v54 }
 0xbbc   :  { %3666 = vst [vmem:[#allocation10 + $0x30] sm:$0xff] %v3650_v55  ;;  %v3577_v45 = vadd.f32 %v3528_v32, %v3294_v2  ;;  %v4969_v15 = vpop.f32.mrf.mxu1  ;;  %v3304_v18 = vadd.f32 %v5773_v16, %v3021_v20  ;;  %v3019_v40 = vadd.f32 %v5757_v29, %v2736_v63 }
 0xbbd   :  { %v3648_v62 = vsel %vm3616_vm5, %v3600_v57, %v3632_v21  ;;  %vm3619_vm6 = vcmp.ge.f32.partialorder %v3603_v4, 0.0  ;;  %v3635_v58 = vmul.f32 0.01, %v3603_v4  ;;  %v3582_v19 = vadd.f32 %v4969_v15, %v3299_v60 }
 0xbbe   :  { %3664 = vst [vmem:[#allocation10 + $0x20] sm:$0xff] %v3648_v62  ;;  %v3601_v14 = vadd.f32 %v5782_v37, %v3577_v45  ;;  %v3541_v22 = vpop.f32.mrf.mxu1  ;;  %v3302_v0 = vadd.f32 %v5776_v36, %v3019_v40 }
 0xbbf   :  { %v3651_v31 = vsel %vm3619_vm6, %v3603_v4, %v3635_v58  ;;  %v3606_v34 = vadd.f32 %v5782_v37, %v3582_v19  ;;  %v3580_v9 = vadd.f32 %v3541_v22, %v3297_v25 }
 0xbc0   :  { %3667 = vst [vmem:[#allocation10 + $0x38] sm:$0xff] %v3651_v31  ;;  %vm3617_vm7 = vcmp.ge.f32.partialorder %v3601_v14, 0.0  ;;  %v3633_v28 = vmul.f32 0.01, %v3601_v14  ;;  %v4970_v47 = vpop.f32.mrf.mxu1 }
 0xbc1   :  { %vm3622_vm8 = vcmp.ge.f32.partialorder %v3606_v34, 0.0  ;;  %v3638_v53 = vmul.f32 0.01, %v3606_v34  ;;  %v3604_v48 = vadd.f32 %v5782_v37, %v3580_v9  ;;  %v3583_v1 = vadd.f32 %v4970_v47, %v3300_v50 }
 0xbc2   :  { %v3649_v24 = vsel %vm3617_vm7, %v3601_v14, %v3633_v28  ;;  %v3544_v11 = vpop.f32.mrf.mxu1 }
 0xbc3   :  { %3665 = vst [vmem:[#allocation10 + $0x28] sm:$0xff] %v3649_v24  ;;  %v3654_v51 = vsel %vm3622_vm8, %v3606_v34, %v3638_v53  ;;  %vm3620_vm9 = vcmp.ge.f32.partialorder %v3604_v48, 0.0  ;;  %v3636_v6 = vmul.f32 0.01, %v3604_v48  ;;  %v3607_v10 = vadd.f32 %v5782_v37, %v3583_v1 }
 0xbc4   :  { %3670 = vst [vmem:[#allocation10 + $0x50] sm:$0xff] %v3654_v51  ;;  %v3581_v33 = vadd.f32 %v3544_v11, %v3298_v38  ;;  %v4973_v8 = vpop.f32.mrf.mxu1 }
 0xbc5   :  { %v3652_v35 = vsel %vm3620_vm9, %v3604_v48, %v3636_v6  ;;  %vm3623_vm10 = vcmp.ge.f32.partialorder %v3607_v10, 0.0  ;;  %v3639_v49 = vmul.f32 0.01, %v3607_v10  ;;  %v3586_v3 = vadd.f32 %v4973_v8, %v3303_v26 }
 0xbc6   :  { %3668 = vst [vmem:[#allocation10 + $0x40] sm:$0xff] %v3652_v35  ;;  %v3605_v56 = vadd.f32 %v5782_v37, %v3581_v33  ;;  %v3557_v12 = vpop.f32.mrf.mxu1 }
 0xbc7   :  { %v3655_v46 = vsel %vm3623_vm10, %v3607_v10, %v3639_v49  ;;  %v3610_v59 = vadd.f32 %v5782_v37, %v3586_v3  ;;  %v3584_v39 = vadd.f32 %v3557_v12, %v3301_v17 }
 0xbc8   :  { %3671 = vst [vmem:[#allocation10 + $0x58] sm:$0xff] %v3655_v46  ;;  %vm3621_vm11 = vcmp.ge.f32.partialorder %v3605_v56, 0.0  ;;  %v3637_v52 = vmul.f32 0.01, %v3605_v56  ;;  %v4974_v27 = vpop.f32.mrf.mxu1 }
 0xbc9   :  { %vm3626_vm12 = vcmp.ge.f32.partialorder %v3610_v59, 0.0  ;;  %v3642_v5 = vmul.f32 0.01, %v3610_v59  ;;  %v3608_v7 = vadd.f32 %v5782_v37, %v3584_v39  ;;  %v3587_v43 = vadd.f32 %v4974_v27, %v3304_v18 }
 0xbca   :  { %v3653_v57 = vsel %vm3621_vm11, %v3605_v56, %v3637_v52  ;;  %v3560_v54 = vpop.f32.mrf.mxu1 }
 0xbcb   :  { %3669 = vst [vmem:[#allocation10 + $0x48] sm:$0xff] %v3653_v57  ;;  %v3658_v16 = vsel %vm3626_vm12, %v3610_v59, %v3642_v5  ;;  %vm3624_vm13 = vcmp.ge.f32.partialorder %v3608_v7, 0.0  ;;  %v3640_v23 = vmul.f32 0.01, %v3608_v7  ;;  %v3611_v2 = vadd.f32 %v5782_v37, %v3587_v43 }
 0xbcc   :  { %3674 = vst [vmem:[#allocation10 + $0x70] sm:$0xff] %v3658_v16  ;;  %v3585_v29 = vadd.f32 %v3560_v54, %v3302_v0 }
 0xbcd   :  { %v3656_v60 = vsel %vm3624_vm13, %v3608_v7, %v3640_v23  ;;  %vm3627_vm14 = vcmp.ge.f32.partialorder %v3611_v2, 0.0  ;;  %v3643_v13 = vmul.f32 0.01, %v3611_v2 }
 0xbce   :  { %3672 = vst [vmem:[#allocation10 + $0x60] sm:$0xff] %v3656_v60  ;;  %v3609_v32 = vadd.f32 %v5782_v37, %v3585_v29 }
 0xbcf   :  { %v3659_v55 = vsel %vm3627_vm14, %v3611_v2, %v3643_v13 }
 0xbd0   :  { %3675 = vst [vmem:[#allocation10 + $0x78] sm:$0xff] %v3659_v55  ;;  %vm3625_vm15 = vcmp.ge.f32.partialorder %v3609_v32, 0.0  ;;  %v3641_v36 = vmul.f32 0.01, %v3609_v32 }
 0xbd2   :  { %v3657_v21 = vsel %vm3625_vm15, %v3609_v32, %v3641_v36 }
 0xbd3   :  { %3673 = vst [vmem:[#allocation10 + $0x68] sm:$0xff] %v3657_v21 }
 0xbd4   :  { %5174 = shalt.err (!%p5171_p5)
}
 0xbd5   :  { %s5197_s9 = smov 128   ;;  %s5198_s10 = smov 8  }
 0xbd6   :  { %3687 = dma.vmem_to_hbm [thread:$0]  %s3682_s7, 2048, %s5841_s4, [#allocation7], %s5197_s9, %s5197_s9, %s5198_s10  }
 0xbd7   :  { %5189 = dma.done.wait [#allocation7], 2048  }
 0xbd8   :  { %5190 = vsyncadd [#allocation7], 4294965248 }
 0xbd9   :  { %3691 = vsyncpa [#allocation6], 1 }
 0xbda   :  { %3692 = vsyncpa [#allocation9], 1 }
 0xbdb   :  { %3693 = vsyncpa [#allocation7], 1 }
 0xbdc   :  { %3694 = vsyncmov [#allocation4] }
 0xbdf   :  { %s3695_s13 = vpop.sfrf %3694 }
 0xbe0   :  { %p3854_p6 = scmp.ne.s32.totalorder %s3695_s13, 0 }
 0xbe2   :  { %3699 = shalt.err (%p3854_p6)  }
 0xbe3   :  { %3701 = vsyncmov [#allocation4 + $0x1] }
 0xbe6   :  { %s3702_s14 = vpop.sfrf %3701 }
 0xbe7   :  { %p3855_p7 = scmp.ne.s32.totalorder %s3702_s14, 0 }
 0xbe9   :  { %3706 = shalt.err (%p3855_p7)  }

</bundles_post_ra>
